<compile_context>
chip_gen: v7x
topology: tpu7x:2x2x1
jax: 0.10.0
libtpu: 0.0.40
codegen_flags: <defaults>
</compile_context>

<pallas_src>
import numpy as np
import jax
import jax.numpy as jnp
from jax.experimental import pallas as pl
from jax.experimental.pallas import tpu as pltpu

D_MODEL = 768
D_FC1 = 256
NUM_CLASSES = 3
C_PAD = 128           # lane-dense logits width (>= NUM_CLASSES, multiple of 128)
TB_MAX = 256          # batch tile cap (matches 2x256^2 MXU on v6e/v7x)


def _round_up(x, m):
    return ((x + m - 1) // m) * m


def head_kernel(cls_ref, wp_ref, bp_ref, w1_ref, b1_ref, w2_ref, b2_ref,
                logits_ref, xemb_ref):
    """BertPooler + classification head for one batch tile.

    cls_ref:  [TB, 768] bf16  CLS-token hidden states
    wp_ref:   [768, 768] bf16, bp_ref: [1, 768] f32   bert.pooler.dense (tanh)
    w1_ref:   [768, 256] bf16, b1_ref: [1, 256] f32   fc1
    w2_ref:   [256, 128] bf16, b2_ref: [1, 128] f32   fc2 (zero-padded lanes)
    logits_ref: [TB, 128] f32  (first NUM_CLASSES lanes are the real logits)
    xemb_ref:   [TB, 256] f32  fc1 pre-activation output (module's 2nd output)
    """
    cls = cls_ref[...]                                              # bf16 [TB, 768]

    # pooler_output = tanh(cls @ Wp + bp)   (bf16 MXU inputs, f32 accumulation)
    pooled = jnp.tanh(
        jnp.dot(cls, wp_ref[...], preferred_element_type=jnp.float32) + bp_ref[...])

    # x_embed = fc1(pooled)   (pre-activation value is one of the module outputs)
    x_embed = (jnp.dot(pooled.astype(jnp.bfloat16), w1_ref[...],
                       preferred_element_type=jnp.float32) + b1_ref[...])
    xemb_ref[...] = x_embed

    # ReLU -> dropout(identity in eval) -> fc2  (lane-dense, padded to 128)
    x = jnp.maximum(x_embed, 0.0).astype(jnp.bfloat16)
    logits_ref[...] = (jnp.dot(x, w2_ref[...], preferred_element_type=jnp.float32)
                       + b2_ref[...])


def prepare_params(wp, bp, w1, b1, w2, b2):
    """One-time (parameter-load-time) prep, hoisted off the per-call path:
    - zero-pad fc2's 3 output columns up to 128 so the logits store is lane-dense
    - cast the three weight matrices to bf16 (MXU inputs); biases stay f32
    """
    n_cls = w2.shape[1]
    w2p = jnp.pad(w2, ((0, 0), (0, C_PAD - n_cls)))
    b2p = jnp.pad(b2, ((0, 0), (0, C_PAD - n_cls)))
    prepped = (wp.astype(jnp.bfloat16), bp.astype(jnp.float32),
               w1.astype(jnp.bfloat16), b1.astype(jnp.float32),
               w2p.astype(jnp.bfloat16), b2p.astype(jnp.float32))
    return prepped, n_cls


def run_head(cls_vec, prepped_params, n_cls):
    """cls_vec: [B, 768] f32 -> (logits [B, n_cls] f32, x_embed [B, 256] f32)."""
    B, D = cls_vec.shape
    wp, bp, w1, b1, w2p, b2p = prepped_params
    d_fc1 = w1.shape[1]

    # Batch tiling: sublane-aligned tile, padded batch, 1-D grid over batch.
    TB = min(TB_MAX, _round_up(B, 8))
    B_pad = _round_up(B, TB)
    n_tiles = B_pad // TB
    cls_p = jnp.pad(cls_vec, ((0, B_pad - B), (0, 0))).astype(jnp.bfloat16)

    def weight_spec(shape):
        # Constant index_map -> weight block stays VMEM-resident across grid
        # steps (fetched once).  bf16 weights total ~1.6 MB, so headroom is
        # ample even on v7x's 64 MiB VMEM with default double-buffering.
        return pl.BlockSpec(shape, lambda b: (0, 0))

    # Megacore: shard batch tiles across TensorCores only when each core gets
    # several tiles; for tiny grids sharding just duplicates the weight DMA.
    dim_sem = ("parallel",) if n_tiles >= 8 else ("arbitrary",)

    flops = 2 * B_pad * (D_MODEL * D_MODEL + D_MODEL * D_FC1 + D_FC1 * C_PAD)
    bytes_accessed = (
        2 * (D_MODEL * D_MODEL + D_MODEL * D_FC1 + D_FC1 * C_PAD)   # bf16 weights
        + 4 * (D_MODEL + D_FC1 + C_PAD)                             # f32 biases
        + 2 * B_pad * D_MODEL                                       # bf16 cls in
        + 4 * B_pad * (C_PAD + d_fc1))                              # f32 outputs

    # NOTE: for tiny batches (B <= ~16) a standalone pallas_call is dominated by
    # fixed launch + weight-DMA cost; fusing this head into the producer of the
    # CLS hidden state would be the next step if that path became hot.
    logits_pad, x_embed_pad = pl.pallas_call(
        head_kernel,
        out_shape=(
            jax.ShapeDtypeStruct((B_pad, C_PAD), jnp.float32),
            jax.ShapeDtypeStruct((B_pad, d_fc1), jnp.float32),
        ),
        grid_spec=pltpu.PrefetchScalarGridSpec(
            num_scalar_prefetch=0,
            grid=(n_tiles,),
            in_specs=[
                pl.BlockSpec((TB, D), lambda b: (b, 0)),   # CLS tiles (pipelined)
                weight_spec(wp.shape), weight_spec(bp.shape),
                weight_spec(w1.shape), weight_spec(b1.shape),
                weight_spec(w2p.shape), weight_spec(b2p.shape),
            ],
            out_specs=(
                pl.BlockSpec((TB, C_PAD), lambda b: (b, 0)),
                pl.BlockSpec((TB, d_fc1), lambda b: (b, 0)),
            ),
        ),
        compiler_params=pltpu.CompilerParams(
            dimension_semantics=dim_sem,
            vmem_limit_bytes=32 * 1024 * 1024,   # sized against v7x's 64 MiB physical
        ),
        cost_estimate=pl.CostEstimate(
            flops=flops,
            transcendentals=B_pad * D_MODEL,     # tanh
            bytes_accessed=bytes_accessed,
        ),
    )(cls_p, wp, bp, w1, b1, w2p, b2p)

    return logits_pad[:B, :n_cls], x_embed_pad[:B]


def reference_head_f32(cls_vec, params):
    """Original PyTorch (eval-mode) semantics in full f32."""
    wp, bp, w1, b1, w2, b2 = params
    pooled = jnp.tanh(cls_vec @ wp + bp)            # bert pooler_output
    x_embed = pooled @ w1 + b1                      # fc1 (pre-activation, returned)
    logits = jnp.maximum(x_embed, 0.0) @ w2 + b2    # ReLU -> dropout(id) -> fc2
    return logits, x_embed


def reference_head_bf16(cls_vec, prepped_params, n_cls):
    """Plain-jnp mirror of the kernel's bf16-input / f32-accumulate path."""
    wp, bp, w1, b1, w2p, b2p = prepped_params
    cls = cls_vec.astype(jnp.bfloat16)
    pooled = jnp.tanh(jnp.dot(cls, wp, preferred_element_type=jnp.float32) + bp)
    x_embed = jnp.dot(pooled.astype(jnp.bfloat16), w1,
                      preferred_element_type=jnp.float32) + b1
    x = jnp.maximum(x_embed, 0.0).astype(jnp.bfloat16)
    logits = jnp.dot(x, w2p, preferred_element_type=jnp.float32) + b2p
    return logits[:, :n_cls], x_embed


if __name__ == "__main__":
    key = jax.random.PRNGKey(0)
    ks = jax.random.split(key, 8)

    B, S, VOCAB = 2, 8, 100

    # Deterministic synthetic parameters (not a pretrained checkpoint).
    wp = jax.random.normal(ks[0], (D_MODEL, D_MODEL), jnp.float32) * 0.02    # bert.pooler.dense
    bp = jnp.zeros((1, D_MODEL), jnp.float32)
    w1 = jax.random.normal(ks[1], (D_MODEL, D_FC1), jnp.float32) * 0.02      # fc1
    b1 = jnp.zeros((1, D_FC1), jnp.float32)
    w2 = jax.random.normal(ks[2], (D_FC1, NUM_CLASSES), jnp.float32) * 0.02  # fc2
    b2 = jnp.zeros((1, NUM_CLASSES), jnp.float32)
    params_f32 = (wp, bp, w1, b1, w2, b2)
    prepped, n_cls = prepare_params(*params_f32)   # one-time pad + bf16 cast (hoisted)

    # TODO(synk): the pretrained BERT encoder (klue/bert-base) has no in-script
    # Pallas equivalent; its last_hidden_state is synthesized with a deterministic
    # embedding lookup, and attention_mask only mirrors the real call signature.
    emb_table = jax.random.normal(ks[3], (VOCAB, D_MODEL), jnp.float32) * 0.1
    input_ids = jax.random.randint(ks[4], (B, S), 0, VOCAB)
    attention_mask = jnp.ones((B, S), jnp.float32)

    last_hidden = emb_table[input_ids]          # [B, S, 768] stand-in last_hidden_state
    cls_hidden = last_hidden[:, 0, :]           # [B, 768] CLS token fed to the pooler

    logits, x_embed = run_head(cls_hidden, prepped, n_cls)
    jax.block_until_ready((logits, x_embed))

    # Check 1: tight check against a plain-jnp mirror of the kernel's bf16 math.
    mref_logits, mref_xemb = reference_head_bf16(cls_hidden, prepped, n_cls)
    assert np.allclose(np.asarray(logits), np.asarray(mref_logits), atol=2e-3, rtol=2e-2)
    assert np.allclose(np.asarray(x_embed), np.asarray(mref_xemb), atol=2e-3, rtol=2e-2)

    # Check 2: sanity against the original full-f32 (PyTorch eval) semantics;
    # bf16 weights/activations require a looser tolerance.
    ref_logits, ref_xemb = reference_head_f32(cls_hidden, params_f32)
    assert np.allclose(np.asarray(logits), np.asarray(ref_logits), atol=1e-2, rtol=5e-2)
    assert np.allclose(np.asarray(x_embed), np.asarray(ref_xemb), atol=1e-2, rtol=5e-2)

    print("KERNEL_OK")
</pallas_src>

<mosaic_0001>
module attributes {stable_mosaic.version = 11 : i64} {
  func.func @head_kernel(%arg0: i32, %arg1: memref<8x768xbf16, #tpu.memory_space<vmem>>, %arg2: memref<768x768xbf16, #tpu.memory_space<vmem>>, %arg3: memref<1x768xf32, #tpu.memory_space<vmem>>, %arg4: memref<768x256xbf16, #tpu.memory_space<vmem>>, %arg5: memref<1x256xf32, #tpu.memory_space<vmem>>, %arg6: memref<256x128xbf16, #tpu.memory_space<vmem>>, %arg7: memref<1x128xf32, #tpu.memory_space<vmem>>, %arg8: memref<8x128xf32, #tpu.memory_space<vmem>>, %arg9: memref<8x256xf32, #tpu.memory_space<vmem>>) attributes {dimension_semantics = [#tpu.dimension_semantics<arbitrary>], iteration_bounds = array<i64: 1>, scalar_prefetch = 0 : i64, scratch_operands = 0 : i64, tpu.core_type = #tpu.core_type<tc>, window_params = [{transform_indices = @transform_0, window_bounds = array<i64: 8, 768>}, {pipeline_mode = #tpu.pipeline_mode<synchronous>, transform_indices = @transform_1, window_bounds = array<i64: 768, 768>}, {pipeline_mode = #tpu.pipeline_mode<synchronous>, transform_indices = @transform_2, window_bounds = array<i64: 1, 768>}, {pipeline_mode = #tpu.pipeline_mode<synchronous>, transform_indices = @transform_3, window_bounds = array<i64: 768, 256>}, {pipeline_mode = #tpu.pipeline_mode<synchronous>, transform_indices = @transform_4, window_bounds = array<i64: 1, 256>}, {pipeline_mode = #tpu.pipeline_mode<synchronous>, transform_indices = @transform_5, window_bounds = array<i64: 256, 128>}, {pipeline_mode = #tpu.pipeline_mode<synchronous>, transform_indices = @transform_6, window_bounds = array<i64: 1, 128>}, {transform_indices = @transform_7, window_bounds = array<i64: 8, 128>}, {transform_indices = @transform_8, window_bounds = array<i64: 8, 256>}]} {
    %c0 = arith.constant 0 : index
    %c0_0 = arith.constant 0 : index
    %0 = vector.load %arg1[%c0, %c0_0] : memref<8x768xbf16, #tpu.memory_space<vmem>>, vector<8x768xbf16>
    %c0_1 = arith.constant 0 : index
    %c0_2 = arith.constant 0 : index
    %1 = vector.load %arg2[%c0_1, %c0_2] : memref<768x768xbf16, #tpu.memory_space<vmem>>, vector<768x768xbf16>
    %cst = arith.constant dense<0.000000e+00> : vector<8x768xf32>
    %2 = tpu.matmul %0, %1, %cst {dimension_numbers = #tpu.dot_dimension_numbers<[1], [0], [0], [1], [0, 0, 1, 1], [], []>} : vector<8x768xbf16>, vector<768x768xbf16>, vector<8x768xf32> -> vector<8x768xf32>
    %c0_3 = arith.constant 0 : index
    %c0_4 = arith.constant 0 : index
    %3 = vector.load %arg3[%c0_3, %c0_4] : memref<1x768xf32, #tpu.memory_space<vmem>>, vector<1x768xf32>
    %4 = vector.broadcast %3 : vector<1x768xf32> to vector<8x768xf32>
    %5 = arith.addf %2, %4 : vector<8x768xf32>
    %6 = math.tanh %5 : vector<8x768xf32>
    %7 = arith.truncf %6 : vector<8x768xf32> to vector<8x768xbf16>
    %c0_5 = arith.constant 0 : index
    %c0_6 = arith.constant 0 : index
    %8 = vector.load %arg4[%c0_5, %c0_6] : memref<768x256xbf16, #tpu.memory_space<vmem>>, vector<768x256xbf16>
    %cst_7 = arith.constant dense<0.000000e+00> : vector<8x256xf32>
    %9 = tpu.matmul %7, %8, %cst_7 {dimension_numbers = #tpu.dot_dimension_numbers<[1], [0], [0], [1], [0, 0, 1, 1], [], []>} : vector<8x768xbf16>, vector<768x256xbf16>, vector<8x256xf32> -> vector<8x256xf32>
    %c0_8 = arith.constant 0 : index
    %c0_9 = arith.constant 0 : index
    %10 = vector.load %arg5[%c0_8, %c0_9] : memref<1x256xf32, #tpu.memory_space<vmem>>, vector<1x256xf32>
    %11 = vector.broadcast %10 : vector<1x256xf32> to vector<8x256xf32>
    %12 = arith.addf %9, %11 : vector<8x256xf32>
    %c0_10 = arith.constant 0 : index
    %c0_11 = arith.constant 0 : index
    %13 = vector.load %arg9[%c0_10, %c0_11] : memref<8x256xf32, #tpu.memory_space<vmem>>, vector<8x256xf32>
    tpu.vector_store %arg9[%c0_10, %c0_11], %12 {strides = array<i32>} : memref<8x256xf32, #tpu.memory_space<vmem>>, vector<8x256xf32>,
    %cst_12 = arith.constant 0.000000e+00 : f32
    %14 = vector.broadcast %cst_12 : f32 to vector<8x256xf32>
    %15 = arith.maximumf %12, %14 : vector<8x256xf32>
    %16 = arith.truncf %15 : vector<8x256xf32> to vector<8x256xbf16>
    %c0_13 = arith.constant 0 : index
    %c0_14 = arith.constant 0 : index
    %17 = vector.load %arg6[%c0_13, %c0_14] : memref<256x128xbf16, #tpu.memory_space<vmem>>, vector<256x128xbf16>
    %cst_15 = arith.constant dense<0.000000e+00> : vector<8x128xf32>
    %18 = tpu.matmul %16, %17, %cst_15 {dimension_numbers = #tpu.dot_dimension_numbers<[1], [0], [0], [1], [0, 0, 1, 1], [], []>} : vector<8x256xbf16>, vector<256x128xbf16>, vector<8x128xf32> -> vector<8x128xf32>
    %c0_16 = arith.constant 0 : index
    %c0_17 = arith.constant 0 : index
    %19 = vector.load %arg7[%c0_16, %c0_17] : memref<1x128xf32, #tpu.memory_space<vmem>>, vector<1x128xf32>
    %20 = vector.broadcast %19 : vector<1x128xf32> to vector<8x128xf32>
    %21 = arith.addf %18, %20 : vector<8x128xf32>
    %c0_18 = arith.constant 0 : index
    %c0_19 = arith.constant 0 : index
    %22 = vector.load %arg8[%c0_18, %c0_19] : memref<8x128xf32, #tpu.memory_space<vmem>>, vector<8x128xf32>
    tpu.vector_store %arg8[%c0_18, %c0_19], %21 {strides = array<i32>} : memref<8x128xf32, #tpu.memory_space<vmem>>, vector<8x128xf32>,
    return
  }
  func.func @transform_0(%arg0: i32) -> (i32, i32) {
    %c0_i32 = arith.constant 0 : i32
    %c0_i32_0 = arith.constant 0 : i32
    return %arg0, %c0_i32 : i32, i32
  }
  func.func @transform_1(%arg0: i32) -> (i32, i32) {
    %c0_i32 = arith.constant 0 : i32
    %c0_i32_0 = arith.constant 0 : i32
    %c0_i32_1 = arith.constant 0 : i32
    return %c0_i32, %c0_i32_0 : i32, i32
  }
  func.func @transform_2(%arg0: i32) -> (i32, i32) {
    %c0_i32 = arith.constant 0 : i32
    %c0_i32_0 = arith.constant 0 : i32
    %c0_i32_1 = arith.constant 0 : i32
    return %c0_i32, %c0_i32_0 : i32, i32
  }
  func.func @transform_3(%arg0: i32) -> (i32, i32) {
    %c0_i32 = arith.constant 0 : i32
    %c0_i32_0 = arith.constant 0 : i32
    %c0_i32_1 = arith.constant 0 : i32
    return %c0_i32, %c0_i32_0 : i32, i32
  }
  func.func @transform_4(%arg0: i32) -> (i32, i32) {
    %c0_i32 = arith.constant 0 : i32
    %c0_i32_0 = arith.constant 0 : i32
    %c0_i32_1 = arith.constant 0 : i32
    return %c0_i32, %c0_i32_0 : i32, i32
  }
  func.func @transform_5(%arg0: i32) -> (i32, i32) {
    %c0_i32 = arith.constant 0 : i32
    %c0_i32_0 = arith.constant 0 : i32
    %c0_i32_1 = arith.constant 0 : i32
    return %c0_i32, %c0_i32_0 : i32, i32
  }
  func.func @transform_6(%arg0: i32) -> (i32, i32) {
    %c0_i32 = arith.constant 0 : i32
    %c0_i32_0 = arith.constant 0 : i32
    %c0_i32_1 = arith.constant 0 : i32
    return %c0_i32, %c0_i32_0 : i32, i32
  }
  func.func @transform_7(%arg0: i32) -> (i32, i32) {
    %c0_i32 = arith.constant 0 : i32
    %c0_i32_0 = arith.constant 0 : i32
    return %arg0, %c0_i32 : i32, i32
  }
  func.func @transform_8(%arg0: i32) -> (i32, i32) {
    %c0_i32 = arith.constant 0 : i32
    %c0_i32_0 = arith.constant 0 : i32
    return %arg0, %c0_i32 : i32, i32
  }
}

</mosaic_0001>

<bundles_post_ra>
// kernel: tpu_custom_call.1
= control target key start
LH: loop header
LB: loop body
LE: loop exit
PB: predicated region body
PF: predicated region fallthrough
CT: control target
= control target key end

     0   :  { %14 = vsyncpa [#allocation3], 0  ;;  %s4749_s0 = inlined_call_operand.hbm [shape: bf16[8,768], index: 0, kind: input, shape index: {}]   ;;  %s4750_s1 = inlined_call_operand.hbm [shape: bf16[768,768], index: 1, kind: input, shape index: {}]   ;;  %s4751_s2 = inlined_call_operand.hbm [shape: f32[1,768], index: 2, kind: input, shape index: {}]   ;;  %s4752_s3 = inlined_call_operand.hbm [shape: bf16[768,256], index: 3, kind: input, shape index: {}]   ;;  %s4753_s4 = inlined_call_operand.hbm [shape: f32[1,256], index: 4, kind: input, shape index: {}]   ;;  %s4754_s5 = inlined_call_operand.hbm [shape: bf16[256,128], index: 5, kind: input, shape index: {}]   ;;  %s4755_s6 = inlined_call_operand.hbm [shape: f32[1,128], index: 6, kind: input, shape index: {}]   ;;  %s4756_s7 = inlined_call_operand.hbm [shape: f32[8,128], index: 7, kind: output, shape index: {0}]   ;;  %s4757_s8 = inlined_call_operand.hbm [shape: f32[8,256], index: 8, kind: output, shape index: {1}]  }
   0x1   :  { %15 = vsyncpa [#allocation6], 0 }
   0x2   :  { %16 = vsyncpa [#allocation9], 0 }
   0x3   :  { %17 = vsyncpa [#allocation12], 0 }
   0x4   :  { %18 = vsyncpa [#allocation4], 0 }
   0x5   :  { %19 = vsyncpa [#allocation16], 0  ;;  %s4512_s27 = smov [#allocation5]   ;;  %s4302_s9 = scalar_lea.hbm %s4750_s1, 36864 }
   0x6   :  { %s35_s28 = sshll.u32 %s4512_s27, 4  ;;  %p4303_p0 = scmp.ne.s32.totalorder %s4750_s1, %s4302_s9  ;;  %s36_s28 = int_to_ptr.vmem [resolvable:$true] %s35_s28 }
   0x7   :  { %p4306_p1 = scmp.lt.u32.totalorder %s4302_s9, %s4750_s1 }
   0x9   :  { %p4308_p2 = pnand %p4306_p1, %p4303_p0 }
   0xb   :  { %4311 = shalt.err (!%p4308_p2)
}
   0xc   :  { %s4312_s14 = scalar_lea.vmem %s36_s28, 36864  ;;  %p4317_p4 = scmp.lt.s32.totalorder %s36_s28, %s36_s28 }
   0xd   :  { %p4313_p3 = scmp.ne.s32.totalorder %s36_s28, %s4312_s14  ;;  %p4318_p5 = scmp.lt.s32.totalorder %s4312_s14, %s4312_s14 }
   0xf   :  { %p4319_p6 = por %p4318_p5, %p4317_p4 }
  0x11   :  { %p4320_p7 = pnand %p4319_p6, %p4313_p3 }
  0x13   :  { %4323 = shalt.err (!%p4320_p7)
}
  0x14   :  { %s4513_s15 = smov 384   ;;  %s4514_s16 = smov 24  }
  0x15   :  { %41 = dma.hbm_to_vmem [thread:$0]  %s4750_s1, 36864, %s36_s28, [#allocation6], %s4513_s15, %s4513_s15, %s4514_s16  }
  0x16   :  { %s4515_s19 = smov [#allocation8]   ;;  %s4324_s23 = scalar_lea.hbm %s4752_s3, 12288 }
  0x17   :  { %s57_s20 = sshll.u32 %s4515_s19, 4  ;;  %p4325_p8 = scmp.ne.s32.totalorder %s4752_s3, %s4324_s23  ;;  %s58_s20 = int_to_ptr.vmem [resolvable:$true] %s57_s20 }
  0x18   :  { %p4328_p9 = scmp.lt.u32.totalorder %s4324_s23, %s4752_s3 }
  0x1a   :  { %p4330_p10 = pnand %p4328_p9, %p4325_p8 }
  0x1c   :  { %4333 = shalt.err (!%p4330_p10)
}
  0x1d   :  { %s4334_s29 = scalar_lea.vmem %s58_s20, 12288  ;;  %p4339_p12 = scmp.lt.s32.totalorder %s58_s20, %s58_s20 }
  0x1e   :  { %p4335_p11 = scmp.ne.s32.totalorder %s58_s20, %s4334_s29  ;;  %p4340_p13 = scmp.lt.s32.totalorder %s4334_s29, %s4334_s29 }
  0x20   :  { %p4341_p0 = por %p4340_p13, %p4339_p12 }
  0x22   :  { %p4342_p1 = pnand %p4341_p0, %p4335_p11 }
  0x24   :  { %4345 = shalt.err (!%p4342_p1)
}
  0x25   :  { %s4516_s1 = smov 128   ;;  %s4517_s28 = smov 8  }
  0x26   :  { %63 = dma.hbm_to_vmem [thread:$0]  %s4752_s3, 12288, %s58_s20, [#allocation9], %s4516_s1, %s4516_s1, %s4517_s28  }
  0x27   :  { %s4518_s10 = smov [#allocation11]   ;;  %s4346_s14 = scalar_lea.hbm %s4754_s5, 2048 }
  0x28   :  { %s79_s11 = sshll.u32 %s4518_s10, 4  ;;  %p4347_p2 = scmp.ne.s32.totalorder %s4754_s5, %s4346_s14  ;;  %s80_s11 = int_to_ptr.vmem [resolvable:$true] %s79_s11 }
  0x29   :  { %p4350_p3 = scmp.lt.u32.totalorder %s4346_s14, %s4754_s5 }
  0x2b   :  { %p4352_p4 = pnand %p4350_p3, %p4347_p2 }
  0x2d   :  { %4355 = shalt.err (!%p4352_p4)
}
  0x2e   :  { %s4356_s19 = scalar_lea.vmem %s80_s11, 2048  ;;  %p4361_p6 = scmp.lt.s32.totalorder %s80_s11, %s80_s11 }
  0x2f   :  { %p4357_p5 = scmp.ne.s32.totalorder %s80_s11, %s4356_s19  ;;  %p4362_p7 = scmp.lt.s32.totalorder %s4356_s19, %s4356_s19 }
  0x31   :  { %p4363_p8 = por %p4362_p7, %p4361_p6 }
  0x33   :  { %p4364_p9 = pnand %p4363_p8, %p4357_p5 }
  0x35   :  { %4367 = shalt.err (!%p4364_p9)
}
  0x36   :  { %s4519_s3 = smov 64   ;;  %s4520_s20 = smov 4  }
  0x37   :  { %85 = dma.hbm_to_vmem [thread:$0]  %s4754_s5, 2048, %s80_s11, [#allocation12], %s4519_s3, %s4519_s3, %s4520_s20  }
  0x38   :  { %s4521_s23 = smov [#allocation2]   ;;  %s4522_s25 = smov [#allocation7]  }
  0x39   :  { %s26_s24 = sshll.u32 %s4521_s23, 4  ;;  %s48_s26 = sshll.u32 %s4522_s25, 4  ;;  %s27_s24 = int_to_ptr.vmem [resolvable:$true] %s26_s24  ;;  %s49_s26 = int_to_ptr.vmem [resolvable:$true] %s48_s26 }
  0x3a   :  { %s4368_s1 = scalar_lea.hbm %s4749_s0, 384 }
  0x3b   :  { %p4369_p10 = scmp.ne.s32.totalorder %s4749_s0, %s4368_s1  ;;  %p4372_p11 = scmp.lt.u32.totalorder %s4368_s1, %s4749_s0 }
  0x3d   :  { %p4374_p12 = pnand %p4372_p11, %p4369_p10 }
  0x3f   :  { %4377 = shalt.err (!%p4374_p12)
}
  0x40   :  { %s4378_s5 = scalar_lea.vmem %s27_s24, 384  ;;  %p4383_p0 = scmp.lt.s32.totalorder %s27_s24, %s27_s24 }
  0x41   :  { %p4379_p13 = scmp.ne.s32.totalorder %s27_s24, %s4378_s5  ;;  %p4384_p1 = scmp.lt.s32.totalorder %s4378_s5, %s4378_s5 }
  0x43   :  { %p4385_p2 = por %p4384_p1, %p4383_p0 }
  0x45   :  { %p4386_p3 = pnand %p4385_p2, %p4379_p13 }
  0x47   :  { %4389 = shalt.err (!%p4386_p3)
}
  0x48   :  { %29 = dma.hbm_to_vmem [thread:$0]  %s4749_s0, 384, %s27_s24, [#allocation3]  }
  0x49   :  { %s4390_s15 = scalar_lea.hbm %s4751_s2, 96 }
  0x4a   :  { %p4391_p4 = scmp.ne.s32.totalorder %s4751_s2, %s4390_s15  ;;  %p4394_p5 = scmp.lt.u32.totalorder %s4390_s15, %s4751_s2 }
  0x4c   :  { %p4396_p6 = pnand %p4394_p5, %p4391_p4 }
  0x4e   :  { %4399 = shalt.err (!%p4396_p6)
}
  0x4f   :  { %s4400_s3 = scalar_lea.vmem %s49_s26, 96  ;;  %p4405_p8 = scmp.lt.s32.totalorder %s49_s26, %s49_s26 }
  0x50   :  { %p4401_p7 = scmp.ne.s32.totalorder %s49_s26, %s4400_s3  ;;  %p4406_p9 = scmp.lt.s32.totalorder %s4400_s3, %s4400_s3 }
  0x52   :  { %p4407_p10 = por %p4406_p9, %p4405_p8 }
  0x54   :  { %p4408_p11 = pnand %p4407_p10, %p4401_p7 }
  0x56   :  { %4411 = shalt.err (!%p4408_p11)
}
  0x57   :  { %51 = dma.hbm_to_vmem [thread:$0]  %s4751_s2, 96, %s49_s26, [#allocation6]  }
  0x58   :  { %s4523_s21 = smov [#allocation10]   ;;  %s4524_s23 = smov [#allocation13]  }
  0x59   :  { %s70_s22 = sshll.u32 %s4523_s21, 4  ;;  %s92_s24 = sshll.u32 %s4524_s23, 4  ;;  %s71_s22 = int_to_ptr.vmem [resolvable:$true] %s70_s22  ;;  %s93_s24 = int_to_ptr.vmem [resolvable:$true] %s92_s24 }
  0x5a   :  { %s4412_s29 = scalar_lea.hbm %s4753_s4, 32 }
  0x5b   :  { %p4413_p12 = scmp.ne.s32.totalorder %s4753_s4, %s4412_s29  ;;  %p4416_p13 = scmp.lt.u32.totalorder %s4412_s29, %s4753_s4 }
  0x5d   :  { %p4418_p0 = pnand %p4416_p13, %p4413_p12 }
  0x5f   :  { %4421 = shalt.err (!%p4418_p0)
}
  0x60   :  { %s4422_s2 = scalar_lea.vmem %s71_s22, 32  ;;  %p4427_p2 = scmp.lt.s32.totalorder %s71_s22, %s71_s22 }
  0x61   :  { %p4423_p1 = scmp.ne.s32.totalorder %s71_s22, %s4422_s2  ;;  %p4428_p3 = scmp.lt.s32.totalorder %s4422_s2, %s4422_s2 }
  0x63   :  { %p4429_p4 = por %p4428_p3, %p4427_p2 }
  0x65   :  { %p4430_p5 = pnand %p4429_p4, %p4423_p1 }
  0x67   :  { %4433 = shalt.err (!%p4430_p5)
}
  0x68   :  { %73 = dma.hbm_to_vmem [thread:$0]  %s4753_s4, 32, %s71_s22, [#allocation9]  }
  0x69   :  { %s4434_s12 = scalar_lea.hbm %s4755_s6, 16 }
  0x6a   :  { %p4435_p6 = scmp.ne.s32.totalorder %s4755_s6, %s4434_s12  ;;  %p4438_p7 = scmp.lt.u32.totalorder %s4434_s12, %s4755_s6 }
  0x6c   :  { %p4440_p8 = pnand %p4438_p7, %p4435_p6 }
  0x6e   :  { %4443 = shalt.err (!%p4440_p8)
}
  0x6f   :  { %s4444_s17 = scalar_lea.vmem %s93_s24, 16  ;;  %s4448_s18 = scalar_lea.vmem %s93_s24, 32 }
  0x70   :  { %p4445_p9 = scmp.ne.s32.totalorder %s93_s24, %s4444_s17  ;;  %p4449_p10 = scmp.lt.s32.totalorder %s93_s24, %s93_s24 }
  0x71   :  { %p4450_p11 = scmp.lt.s32.totalorder %s4448_s18, %s4444_s17 }
  0x73   :  { %p4451_p12 = por %p4450_p11, %p4449_p10 }
  0x75   :  { %p4452_p13 = pnand %p4451_p12, %p4445_p9 }
  0x77   :  { %4455 = shalt.err (!%p4452_p13)
}
  0x78   :  { %95 = dma.hbm_to_vmem [thread:$0]  %s4755_s6, 16, %s93_s24, [#allocation12]  }
  0x79   :  { %4500 = dma.done.wait [#allocation3], 384  }
  0x7a   :  { %4501 = vsyncadd [#allocation3], 4294966912 }
  0x7b   :  { %4502 = dma.done.wait [#allocation6], 36960  }
  0x7c   :  { %4503 = vsyncadd [#allocation6], 4294930336 }
  0x7d   :  { %4504 = dma.done.wait [#allocation9], 12320  }
  0x7e   :  { %4505 = vsyncadd [#allocation9], 4294954976 }
  0x7f   :  { %4506 = dma.done.wait [#allocation12], 2064  }
  0x80   :  { %4507 = vsyncadd [#allocation12], 4294965232  ;;  %v3692_v0 = vld [vmem:[#allocation5 + $0x4] ss:$24 sps:$4 sm:$0xff]   ;;  %v3696_v2 = vld [vmem:[#allocation5] ss:$24 sps:$4 sm:$0xff]  }
  0x81   :  { %v3694_v1 = vld [vmem:[#allocation5 + $0xc] ss:$24 sps:$4 sm:$0xff]   ;;  %1902 = vmatprep.subr.bf16.mxu0 %v3692_v0  ;;  %v3697_v3 = vld [vmem:[#allocation5 + $0x8] ss:$24 sps:$4 sm:$0xff]   ;;  %v3700_v5 = vld [vmem:[#allocation5 + $0x3c] ss:$24 sps:$4 sm:$0xff]  }
  0x82   :  { %2025 = vmatprep.subr.bf16.mxu1 %v3694_v1  ;;  %v3698_v4 = vld [vmem:[#allocation5 + $0x34] ss:$24 sps:$4 sm:$0xff]   ;;  %1903 = vmatpush1.bf16.msra.mxu0 %v3696_v2  ;;  %v3702_v6 = vld [vmem:[#allocation5 + $0x30] ss:$24 sps:$4 sm:$0xff]   ;;  %v3704_v8 = vld [vmem:[#allocation5 + $0x64] ss:$24 sps:$4 sm:$0xff]  }
  0x83   :  { %2026 = vmatpush1.bf16.msra.mxu1 %v3697_v3  ;;  %1904 = vmatprep.subr.bf16.mxu0 %v3698_v4  ;;  %v3703_v7 = vld [vmem:[#allocation5 + $0x38] ss:$24 sps:$4 sm:$0xff]   ;;  %v3706_v9 = vld [vmem:[#allocation5 + $0x6c] ss:$24 sps:$4 sm:$0xff]   ;;  %v3709_v11 = vld [vmem:[#allocation5 + $0x68] ss:$24 sps:$4 sm:$0xff]  }
  0x84   :  { %2027 = vmatprep.subr.bf16.mxu1 %v3700_v5  ;;  %v3708_v10 = vld [vmem:[#allocation5 + $0x60] ss:$24 sps:$4 sm:$0xff]   ;;  %v3710_v12 = vld [vmem:[#allocation5 + $0x94] ss:$24 sps:$4 sm:$0xff]   ;;  %v3714_v14 = vld [vmem:[#allocation5 + $0x90] ss:$24 sps:$4 sm:$0xff]  }
  0x85   :  { %v3712_v13 = vld [vmem:[#allocation5 + $0x9c] ss:$24 sps:$4 sm:$0xff]   ;;  %v3715_v15 = vld [vmem:[#allocation5 + $0x98] ss:$24 sps:$4 sm:$0xff]   ;;  %v3718_v17 = vld [vmem:[#allocation5 + $0xcc] ss:$24 sps:$4 sm:$0xff]  }
  0x86   :  { %1905 = vmatpush1.bf16.msra.mxu0 %v3702_v6  ;;  %v3716_v16 = vld [vmem:[#allocation5 + $0xc4] ss:$24 sps:$4 sm:$0xff]   ;;  %v3720_v18 = vld [vmem:[#allocation5 + $0xc0] ss:$24 sps:$4 sm:$0xff]   ;;  %v3722_v20 = vld [vmem:[#allocation5 + $0xf4] ss:$24 sps:$4 sm:$0xff]  }
  0x87   :  { %2028 = vmatpush1.bf16.msra.mxu1 %v3703_v7  ;;  %1906 = vmatprep.subr.bf16.mxu0 %v3704_v8  ;;  %v3721_v19 = vld [vmem:[#allocation5 + $0xc8] ss:$24 sps:$4 sm:$0xff]   ;;  %v3724_v21 = vld [vmem:[#allocation5 + $0xfc] ss:$24 sps:$4 sm:$0xff]   ;;  %v3727_v23 = vld [vmem:[#allocation5 + $0xf8] ss:$24 sps:$4 sm:$0xff]  }
  0x88   :  { %2029 = vmatprep.subr.bf16.mxu1 %v3706_v9  ;;  %v3726_v22 = vld [vmem:[#allocation5 + $0xf0] ss:$24 sps:$4 sm:$0xff]   ;;  %v3728_v24 = vld [vmem:[#allocation5 + $0x124] ss:$24 sps:$4 sm:$0xff]   ;;  %v3732_v26 = vld [vmem:[#allocation5 + $0x120] ss:$24 sps:$4 sm:$0xff]  }
  0x89   :  { %v3730_v25 = vld [vmem:[#allocation5 + $0x12c] ss:$24 sps:$4 sm:$0xff]   ;;  %v3733_v27 = vld [vmem:[#allocation5 + $0x128] ss:$24 sps:$4 sm:$0xff]   ;;  %v3736_v29 = vld [vmem:[#allocation5 + $0x15c] ss:$24 sps:$4 sm:$0xff]  }
  0x8a   :  { %1907 = vmatpush1.bf16.msra.mxu0 %v3708_v10  ;;  %v3734_v28 = vld [vmem:[#allocation5 + $0x154] ss:$24 sps:$4 sm:$0xff]   ;;  %v3738_v30 = vld [vmem:[#allocation5 + $0x150] ss:$24 sps:$4 sm:$0xff]   ;;  %v3740_v32 = vld [vmem:[#allocation5 + $0x184] ss:$24 sps:$4 sm:$0xff]  }
  0x8b   :  { %2030 = vmatpush1.bf16.msra.mxu1 %v3709_v11  ;;  %1908 = vmatprep.subr.bf16.mxu0 %v3710_v12  ;;  %v3739_v31 = vld [vmem:[#allocation5 + $0x158] ss:$24 sps:$4 sm:$0xff]   ;;  %v3742_v33 = vld [vmem:[#allocation5 + $0x18c] ss:$24 sps:$4 sm:$0xff]   ;;  %v3745_v35 = vld [vmem:[#allocation5 + $0x188] ss:$24 sps:$4 sm:$0xff]  }
  0x8c   :  { %2031 = vmatprep.subr.bf16.mxu1 %v3712_v13  ;;  %v3744_v34 = vld [vmem:[#allocation5 + $0x180] ss:$24 sps:$4 sm:$0xff]   ;;  %v3746_v36 = vld [vmem:[#allocation5 + $0x1b4] ss:$24 sps:$4 sm:$0xff]   ;;  %v3750_v38 = vld [vmem:[#allocation5 + $0x1b0] ss:$24 sps:$4 sm:$0xff]  }
  0x8d   :  { %v3748_v37 = vld [vmem:[#allocation5 + $0x1bc] ss:$24 sps:$4 sm:$0xff]   ;;  %v3751_v39 = vld [vmem:[#allocation5 + $0x1b8] ss:$24 sps:$4 sm:$0xff]   ;;  %v3754_v41 = vld [vmem:[#allocation5 + $0x1ec] ss:$24 sps:$4 sm:$0xff]  }
  0x8e   :  { %1909 = vmatpush1.bf16.msra.mxu0 %v3714_v14  ;;  %v3752_v40 = vld [vmem:[#allocation5 + $0x1e4] ss:$24 sps:$4 sm:$0xff]   ;;  %v3756_v42 = vld [vmem:[#allocation5 + $0x1e0] ss:$24 sps:$4 sm:$0xff]   ;;  %v3758_v44 = vld [vmem:[#allocation5 + $0x214] ss:$24 sps:$4 sm:$0xff]  }
  0x8f   :  { %2032 = vmatpush1.bf16.msra.mxu1 %v3715_v15  ;;  %1910 = vmatprep.subr.bf16.mxu0 %v3716_v16  ;;  %v3757_v43 = vld [vmem:[#allocation5 + $0x1e8] ss:$24 sps:$4 sm:$0xff]   ;;  %v3760_v45 = vld [vmem:[#allocation5 + $0x21c] ss:$24 sps:$4 sm:$0xff]   ;;  %v3763_v49 = vld [vmem:[#allocation5 + $0x218] ss:$24 sps:$4 sm:$0xff]  }
  0x90   :  { %2033 = vmatprep.subr.bf16.mxu1 %v3718_v17  ;;  %v118_v46 = vld [vmem:[#allocation2] sm:$0xff]  ;;  %v3764_v50 = vld [vmem:[#allocation5 + $0x244] ss:$24 sps:$4 sm:$0xff]   ;;  %v3768_v52 = vld [vmem:[#allocation5 + $0x240] ss:$24 sps:$4 sm:$0xff]   ;;  %s4525_s6 = smov [#allocation15]  }
  0x91   :  { %v3762_v47 = vld [vmem:[#allocation5 + $0x210] ss:$24 sps:$4 sm:$0xff]   ;;  %v4656_v48 = vcombine.high %v118_v46, %v118_v46  ;;  %v3766_v51 = vld [vmem:[#allocation5 + $0x24c] ss:$24 sps:$4 sm:$0xff]   ;;  %v3772_v55 = vld [vmem:[#allocation5 + $0x27c] ss:$24 sps:$4 sm:$0xff]   ;;  %v4660_v5 = vcombine.low %v118_v46, %v118_v46 }
  0x92   :  { %1911 = vmatpush1.bf16.msra.mxu0 %v3720_v18  ;;  %v3769_v53 = vld [vmem:[#allocation5 + $0x248] ss:$24 sps:$4 sm:$0xff]   ;;  %v3770_v54 = vld [vmem:[#allocation5 + $0x274] ss:$24 sps:$4 sm:$0xff]   ;;  %v3775_v57 = vld [vmem:[#allocation5 + $0x278] ss:$24 sps:$4 sm:$0xff]  }
  0x93   :  { %2034 = vmatpush1.bf16.msra.mxu1 %v3721_v19  ;;  %1912 = vmatprep.subr.bf16.mxu0 %v3722_v20  ;;  %v3774_v56 = vld [vmem:[#allocation5 + $0x270] ss:$24 sps:$4 sm:$0xff]   ;;  %v3776_v58 = vld [vmem:[#allocation5 + $0x2a4] ss:$24 sps:$4 sm:$0xff]   ;;  %v3780_v60 = vld [vmem:[#allocation5 + $0x2a0] ss:$24 sps:$4 sm:$0xff]  }
  0x94   :  { %2035 = vmatprep.subr.bf16.mxu1 %v3724_v21  ;;  %1934 = vmatprep.mubr.bf16.mxu0 %v4656_v48  ;;  %v3778_v59 = vld [vmem:[#allocation5 + $0x2ac] ss:$24 sps:$4 sm:$0xff]   ;;  %v3781_v61 = vld [vmem:[#allocation5 + $0x2a8] ss:$24 sps:$4 sm:$0xff]   ;;  %v3784_v63 = vld [vmem:[#allocation5 + $0x2dc] ss:$24 sps:$4 sm:$0xff]  }
  0x95   :  { %2057 = vmatprep.mubr.bf16.mxu1 %v4656_v48  ;;  %v3782_v62 = vld [vmem:[#allocation5 + $0x2d4] ss:$24 sps:$4 sm:$0xff]   ;;  %v3786_v0 = vld [vmem:[#allocation5 + $0x2d0] ss:$24 sps:$4 sm:$0xff]   ;;  %v3791_v2 = vld [vmem:[#allocation5 + $0x304] ss:$24 sps:$4 sm:$0xff]  }
  0x96   :  { %1913 = vmatpush1.bf16.msra.mxu0 %v3726_v22  ;;  %v3787_v1 = vld [vmem:[#allocation5 + $0x2d8] ss:$24 sps:$4 sm:$0xff]   ;;  %v3794_v3 = vld [vmem:[#allocation5 + $0x30c] ss:$24 sps:$4 sm:$0xff]   ;;  %v3792_v6 = vld [vmem:[#allocation5 + $0x308] ss:$24 sps:$4 sm:$0xff]  }
  0x97   :  { %2036 = vmatpush1.bf16.msra.mxu1 %v3727_v23  ;;  %1914 = vmatprep.subr.bf16.mxu0 %v3728_v24  ;;  %v3789_v4 = vld [vmem:[#allocation5 + $0x300] ss:$24 sps:$4 sm:$0xff]   ;;  %v3798_v7 = vld [vmem:[#allocation5 + $0x334] ss:$24 sps:$4 sm:$0xff]   ;;  %v3796_v9 = vld [vmem:[#allocation5 + $0x330] ss:$24 sps:$4 sm:$0xff]  }
  0x98   :  { %2037 = vmatprep.subr.bf16.mxu1 %v3730_v25  ;;  %v3801_v8 = vld [vmem:[#allocation5 + $0x33c] ss:$24 sps:$4 sm:$0xff]   ;;  %v3799_v10 = vld [vmem:[#allocation5 + $0x338] ss:$24 sps:$4 sm:$0xff]   ;;  %v3807_v12 = vld [vmem:[#allocation5 + $0x36c] ss:$24 sps:$4 sm:$0xff]  }
  0x99   :  { %v3804_v11 = vld [vmem:[#allocation5 + $0x364] ss:$24 sps:$4 sm:$0xff]   ;;  %v3802_v13 = vld [vmem:[#allocation5 + $0x360] ss:$24 sps:$4 sm:$0xff]   ;;  %v3810_v15 = vld [vmem:[#allocation5 + $0x394] ss:$24 sps:$4 sm:$0xff]  }
  0x9a   :  { %1915 = vmatpush1.bf16.msra.mxu0 %v3732_v26  ;;  %v3805_v14 = vld [vmem:[#allocation5 + $0x368] ss:$24 sps:$4 sm:$0xff]   ;;  %v3813_v16 = vld [vmem:[#allocation5 + $0x39c] ss:$24 sps:$4 sm:$0xff]   ;;  %v3811_v18 = vld [vmem:[#allocation5 + $0x398] ss:$24 sps:$4 sm:$0xff]  }
  0x9b   :  { %2038 = vmatpush1.bf16.msra.mxu1 %v3733_v27  ;;  %1916 = vmatprep.subr.bf16.mxu0 %v3734_v28  ;;  %v3808_v17 = vld [vmem:[#allocation5 + $0x390] ss:$24 sps:$4 sm:$0xff]   ;;  %v3816_v19 = vld [vmem:[#allocation5 + $0x3c4] ss:$24 sps:$4 sm:$0xff]   ;;  %v3814_v21 = vld [vmem:[#allocation5 + $0x3c0] ss:$24 sps:$4 sm:$0xff]  }
  0x9c   :  { %2039 = vmatprep.subr.bf16.mxu1 %v3736_v29  ;;  %v3819_v20 = vld [vmem:[#allocation5 + $0x3cc] ss:$24 sps:$4 sm:$0xff]   ;;  %v3817_v22 = vld [vmem:[#allocation5 + $0x3c8] ss:$24 sps:$4 sm:$0xff]   ;;  %v3825_v24 = vld [vmem:[#allocation5 + $0x3fc] ss:$24 sps:$4 sm:$0xff]  }
  0x9d   :  { %v3822_v23 = vld [vmem:[#allocation5 + $0x3f4] ss:$24 sps:$4 sm:$0xff]   ;;  %v3820_v25 = vld [vmem:[#allocation5 + $0x3f0] ss:$24 sps:$4 sm:$0xff]   ;;  %v3828_v27 = vld [vmem:[#allocation5 + $0x424] ss:$24 sps:$4 sm:$0xff]  }
  0x9e   :  { %1917 = vmatpush1.bf16.msra.mxu0 %v3738_v30  ;;  %v3823_v26 = vld [vmem:[#allocation5 + $0x3f8] ss:$24 sps:$4 sm:$0xff]   ;;  %v3831_v28 = vld [vmem:[#allocation5 + $0x42c] ss:$24 sps:$4 sm:$0xff]   ;;  %s3192_s3 = sshll.u32 %s4525_s6, 4  ;;  %s3193_s3 = int_to_ptr.vmem [resolvable:$true] %s3192_s3 }
  0x9f   :  { %2040 = vmatpush1.bf16.msra.mxu1 %v3739_v31  ;;  %1918 = vmatprep.subr.bf16.mxu0 %v3740_v32  ;;  %v4664_v29 = vld [vmem:[#allocation2 + $0x8] sm:$0xff]  ;;  %v3826_v31 = vld [vmem:[#allocation5 + $0x420] ss:$24 sps:$4 sm:$0xff]   ;;  %v3855_v46 = vld [vmem:[#allocation5 + $0x4ec] ss:$24 sps:$4 sm:$0xff]   ;;  %s4456_s0 = scalar_lea.vmem %s3193_s3, 256  ;;  %p4461_p1 = scmp.lt.s32.totalorder %s3193_s3, %s3193_s3 }
  0xa0   :  { %2041 = vmatprep.subr.bf16.mxu1 %v3742_v33  ;;  %v4668_v30 = vcombine.high %v4664_v29, %v4664_v29  ;;  %v3829_v32 = vld [vmem:[#allocation5 + $0x428] ss:$24 sps:$4 sm:$0xff]   ;;  %v3834_v33 = vld [vmem:[#allocation5 + $0x454] ss:$24 sps:$4 sm:$0xff]   ;;  %p4457_p0 = scmp.ne.s32.totalorder %s3193_s3, %s4456_s0  ;;  %p4462_p2 = scmp.lt.s32.totalorder %s4456_s0, %s4456_s0 }
  0xa2   :  { %1919 = vmatpush1.bf16.msra.mxu0 %v3744_v34  ;;  %v3837_v34 = vld [vmem:[#allocation5 + $0x45c] ss:$24 sps:$4 sm:$0xff]   ;;  %p4463_p3 = por %p4462_p2, %p4461_p1 }
  0xa3   :  { %2042 = vmatpush1.bf16.msra.mxu1 %v3745_v35  ;;  %1920 = vmatprep.subr.bf16.mxu0 %v3746_v36  ;;  %v3832_v35 = vld [vmem:[#allocation5 + $0x450] ss:$24 sps:$4 sm:$0xff]  }
  0xa4   :  { %2043 = vmatprep.subr.bf16.mxu1 %v3748_v37  ;;  %v3835_v36 = vld [vmem:[#allocation5 + $0x458] ss:$24 sps:$4 sm:$0xff]   ;;  %v3840_v37 = vld [vmem:[#allocation5 + $0x484] ss:$24 sps:$4 sm:$0xff]   ;;  %p4464_p4 = pnand %p4463_p3, %p4457_p0 }
  0xa6   :  { %1921 = vmatpush1.bf16.msra.mxu0 %v3750_v38  ;;  %v3843_v38 = vld [vmem:[#allocation5 + $0x48c] ss:$24 sps:$4 sm:$0xff]  }
  0xa7   :  { %2044 = vmatpush1.bf16.msra.mxu1 %v3751_v39  ;;  %1922 = vmatprep.subr.bf16.mxu0 %v3752_v40  ;;  %v3838_v39 = vld [vmem:[#allocation5 + $0x480] ss:$24 sps:$4 sm:$0xff]  }
  0xa8   :  { %2045 = vmatprep.subr.bf16.mxu1 %v3754_v41  ;;  %v3841_v40 = vld [vmem:[#allocation5 + $0x488] ss:$24 sps:$4 sm:$0xff]   ;;  %v3846_v41 = vld [vmem:[#allocation5 + $0x4b4] ss:$24 sps:$4 sm:$0xff]  }
  0xaa   :  { %1923 = vmatpush1.bf16.msra.mxu0 %v3756_v42  ;;  %v3849_v42 = vld [vmem:[#allocation5 + $0x4bc] ss:$24 sps:$4 sm:$0xff]  }
  0xab   :  { %2046 = vmatpush1.bf16.msra.mxu1 %v3757_v43  ;;  %1924 = vmatprep.subr.bf16.mxu0 %v3758_v44  ;;  %v3844_v43 = vld [vmem:[#allocation5 + $0x4b0] ss:$24 sps:$4 sm:$0xff]  }
  0xac   :  { %2047 = vmatprep.subr.bf16.mxu1 %v3760_v45  ;;  %v3847_v44 = vld [vmem:[#allocation5 + $0x4b8] ss:$24 sps:$4 sm:$0xff]   ;;  %v3852_v45 = vld [vmem:[#allocation5 + $0x4e4] ss:$24 sps:$4 sm:$0xff]  }
  0xae   :  { %1925 = vmatpush1.bf16.msra.mxu0 %v3762_v47  ;;  %v3850_v47 = vld [vmem:[#allocation5 + $0x4e0] ss:$24 sps:$4 sm:$0xff]  }
  0xaf   :  { %2048 = vmatpush1.bf16.msra.mxu1 %v3763_v49  ;;  %1926 = vmatprep.subr.bf16.mxu0 %v3764_v50  ;;  %v3853_v49 = vld [vmem:[#allocation5 + $0x4e8] ss:$24 sps:$4 sm:$0xff]   ;;  %v3858_v50 = vld [vmem:[#allocation5 + $0x514] ss:$24 sps:$4 sm:$0xff]  }
  0xb0   :  { %2049 = vmatprep.subr.bf16.mxu1 %v3766_v51  ;;  %v3861_v51 = vld [vmem:[#allocation5 + $0x51c] ss:$24 sps:$4 sm:$0xff]  }
  0xb2   :  { %1927 = vmatpush1.bf16.msra.mxu0 %v3768_v52  ;;  %v3856_v52 = vld [vmem:[#allocation5 + $0x510] ss:$24 sps:$4 sm:$0xff]  }
  0xb3   :  { %2050 = vmatpush1.bf16.msra.mxu1 %v3769_v53  ;;  %1928 = vmatprep.subr.bf16.mxu0 %v3770_v54  ;;  %v3859_v53 = vld [vmem:[#allocation5 + $0x518] ss:$24 sps:$4 sm:$0xff]   ;;  %v3864_v54 = vld [vmem:[#allocation5 + $0x544] ss:$24 sps:$4 sm:$0xff]  }
  0xb4   :  { %2051 = vmatprep.subr.bf16.mxu1 %v3772_v55  ;;  %v3867_v55 = vld [vmem:[#allocation5 + $0x54c] ss:$24 sps:$4 sm:$0xff]  }
  0xb6   :  { %1929 = vmatpush1.bf16.msra.mxu0 %v3774_v56  ;;  %v3862_v56 = vld [vmem:[#allocation5 + $0x540] ss:$24 sps:$4 sm:$0xff]  }
  0xb7   :  { %2052 = vmatpush1.bf16.msra.mxu1 %v3775_v57  ;;  %1930 = vmatprep.subr.bf16.mxu0 %v3776_v58  ;;  %v3865_v57 = vld [vmem:[#allocation5 + $0x548] ss:$24 sps:$4 sm:$0xff]   ;;  %v3870_v58 = vld [vmem:[#allocation5 + $0x574] ss:$24 sps:$4 sm:$0xff]  }
  0xb8   :  { %2053 = vmatprep.subr.bf16.mxu1 %v3778_v59  ;;  %v3873_v59 = vld [vmem:[#allocation5 + $0x57c] ss:$24 sps:$4 sm:$0xff]  }
  0xba   :  { %1931 = vmatpush1.bf16.msra.mxu0 %v3780_v60  ;;  %v3868_v60 = vld [vmem:[#allocation5 + $0x570] ss:$24 sps:$4 sm:$0xff]  }
  0xbb   :  { %2054 = vmatpush1.bf16.msra.mxu1 %v3781_v61  ;;  %1932 = vmatprep.subr.bf16.mxu0 %v3782_v62  ;;  %v3871_v61 = vld [vmem:[#allocation5 + $0x578] ss:$24 sps:$4 sm:$0xff]   ;;  %v3876_v62 = vld [vmem:[#allocation5 + $0x5a4] ss:$24 sps:$4 sm:$0xff]  }
  0xbc   :  { %2055 = vmatprep.subr.bf16.mxu1 %v3784_v63  ;;  %v3879_v63 = vld [vmem:[#allocation5 + $0x5ac] ss:$24 sps:$4 sm:$0xff]  }
  0xbe   :  { %1933 = vmatpush1.bf16.msra.mxu0 %v3786_v0  ;;  %v3874_v0 = vld [vmem:[#allocation5 + $0x5a0] ss:$24 sps:$4 sm:$0xff]  }
  0xbf   :  { %2056 = vmatpush1.bf16.msra.mxu1 %v3787_v1  ;;  %1943 = vmatprep.subr.bf16.mxu0 %v3791_v2  ;;  %v3877_v1 = vld [vmem:[#allocation5 + $0x5a8] ss:$24 sps:$4 sm:$0xff]   ;;  %v3882_v2 = vld [vmem:[#allocation5 + $0x5d4] ss:$24 sps:$4 sm:$0xff]  }
  0xc0   :  { %2066 = vmatprep.subr.bf16.mxu1 %v3794_v3  ;;  %v3885_v3 = vld [vmem:[#allocation5 + $0x5dc] ss:$24 sps:$4 sm:$0xff]  }
  0xc1   :  { %1935 = vmatmul.mubr.bf16.vlgmr.msra.gmra.mrb[0].mxu0 %v4660_v5 }
  0xc2   :  { %2058 = vmatmul.mubr.bf16.vlgmr.msra.gmra.mrb[0].mxu1 %v4660_v5  ;;  %1944 = vmatpush1.bf16.msra.mxu0 %v3789_v4  ;;  %v3880_v4 = vld [vmem:[#allocation5 + $0x5d0] ss:$24 sps:$4 sm:$0xff]  }
  0xc3   :  { %2067 = vmatpush1.bf16.msra.mxu1 %v3792_v6  ;;  %1945 = vmatprep.subr.bf16.mxu0 %v3798_v7  ;;  %v3883_v6 = vld [vmem:[#allocation5 + $0x5d8] ss:$24 sps:$4 sm:$0xff]   ;;  %v3890_v7 = vld [vmem:[#allocation5 + $0x604] ss:$24 sps:$4 sm:$0xff]  }
  0xc4   :  { %2068 = vmatprep.subr.bf16.mxu1 %v3801_v8  ;;  %1975 = vmatprep.mubr.bf16.mxu0 %v4668_v30  ;;  %v3893_v8 = vld [vmem:[#allocation5 + $0x60c] ss:$24 sps:$4 sm:$0xff]  }
  0xc5   :  { %2098 = vmatprep.mubr.bf16.mxu1 %v4668_v30 }
  0xc6   :  { %1946 = vmatpush1.bf16.msra.mxu0 %v3796_v9  ;;  %v4674_v9 = vcombine.low %v4664_v29, %v4664_v29  ;;  %v3915_v29 = vld [vmem:[#allocation5 + $0x6c8] ss:$24 sps:$4 sm:$0xff]  }
  0xc7   :  { %2069 = vmatpush1.bf16.msra.mxu1 %v3799_v10  ;;  %1947 = vmatprep.subr.bf16.mxu0 %v3804_v11  ;;  %v3888_v10 = vld [vmem:[#allocation5 + $0x600] ss:$24 sps:$4 sm:$0xff]  }
  0xc8   :  { %2070 = vmatprep.subr.bf16.mxu1 %v3807_v12  ;;  %v3891_v11 = vld [vmem:[#allocation5 + $0x608] ss:$24 sps:$4 sm:$0xff]   ;;  %v3896_v12 = vld [vmem:[#allocation5 + $0x634] ss:$24 sps:$4 sm:$0xff]  }
  0xca   :  { %1948 = vmatpush1.bf16.msra.mxu0 %v3802_v13  ;;  %v4676_v13 = vld [vmem:[#allocation2 + $0x10] sm:$0xff] }
  0xcb   :  { %2071 = vmatpush1.bf16.msra.mxu1 %v3805_v14  ;;  %1949 = vmatprep.subr.bf16.mxu0 %v3810_v15  ;;  %v3899_v14 = vld [vmem:[#allocation5 + $0x63c] ss:$24 sps:$4 sm:$0xff]   ;;  %v4680_v15 = vcombine.high %v4676_v13, %v4676_v13 }
  0xcc   :  { %2072 = vmatprep.subr.bf16.mxu1 %v3813_v16  ;;  %v3894_v16 = vld [vmem:[#allocation5 + $0x630] ss:$24 sps:$4 sm:$0xff]  }
  0xce   :  { %1950 = vmatpush1.bf16.msra.mxu0 %v3808_v17  ;;  %v3897_v17 = vld [vmem:[#allocation5 + $0x638] ss:$24 sps:$4 sm:$0xff]  }
  0xcf   :  { %2073 = vmatpush1.bf16.msra.mxu1 %v3811_v18  ;;  %1951 = vmatprep.subr.bf16.mxu0 %v3816_v19  ;;  %v3902_v18 = vld [vmem:[#allocation5 + $0x664] ss:$24 sps:$4 sm:$0xff]  }
  0xd0   :  { %2074 = vmatprep.subr.bf16.mxu1 %v3819_v20  ;;  %v3905_v19 = vld [vmem:[#allocation5 + $0x66c] ss:$24 sps:$4 sm:$0xff]   ;;  %v3900_v20 = vld [vmem:[#allocation5 + $0x660] ss:$24 sps:$4 sm:$0xff]  }
  0xd2   :  { %1952 = vmatpush1.bf16.msra.mxu0 %v3814_v21  ;;  %v3903_v21 = vld [vmem:[#allocation5 + $0x668] ss:$24 sps:$4 sm:$0xff]  }
  0xd3   :  { %2075 = vmatpush1.bf16.msra.mxu1 %v3817_v22  ;;  %1953 = vmatprep.subr.bf16.mxu0 %v3822_v23  ;;  %v3908_v22 = vld [vmem:[#allocation5 + $0x694] ss:$24 sps:$4 sm:$0xff]  }
  0xd4   :  { %2076 = vmatprep.subr.bf16.mxu1 %v3825_v24  ;;  %v3911_v23 = vld [vmem:[#allocation5 + $0x69c] ss:$24 sps:$4 sm:$0xff]   ;;  %v3906_v24 = vld [vmem:[#allocation5 + $0x690] ss:$24 sps:$4 sm:$0xff]  }
  0xd6   :  { %1954 = vmatpush1.bf16.msra.mxu0 %v3820_v25  ;;  %v3909_v25 = vld [vmem:[#allocation5 + $0x698] ss:$24 sps:$4 sm:$0xff]  }
  0xd7   :  { %2077 = vmatpush1.bf16.msra.mxu1 %v3823_v26  ;;  %1955 = vmatprep.subr.bf16.mxu0 %v3828_v27  ;;  %v3914_v26 = vld [vmem:[#allocation5 + $0x6c4] ss:$24 sps:$4 sm:$0xff]  }
  0xd8   :  { %2078 = vmatprep.subr.bf16.mxu1 %v3831_v28  ;;  %v3917_v27 = vld [vmem:[#allocation5 + $0x6cc] ss:$24 sps:$4 sm:$0xff]   ;;  %v3912_v28 = vld [vmem:[#allocation5 + $0x6c0] ss:$24 sps:$4 sm:$0xff]  }
  0xda   :  { %1956 = vmatpush1.bf16.msra.mxu0 %v3826_v31  ;;  %v3920_v31 = vld [vmem:[#allocation5 + $0x6f4] ss:$24 sps:$4 sm:$0xff]  }
  0xdb   :  { %2079 = vmatpush1.bf16.msra.mxu1 %v3829_v32  ;;  %1957 = vmatprep.subr.bf16.mxu0 %v3834_v33  ;;  %v3923_v32 = vld [vmem:[#allocation5 + $0x6fc] ss:$24 sps:$4 sm:$0xff]   ;;  %v3918_v33 = vld [vmem:[#allocation5 + $0x6f0] ss:$24 sps:$4 sm:$0xff]  }
  0xdc   :  { %2080 = vmatprep.subr.bf16.mxu1 %v3837_v34  ;;  %v3921_v34 = vld [vmem:[#allocation5 + $0x6f8] ss:$24 sps:$4 sm:$0xff]  }
  0xde   :  { %1958 = vmatpush1.bf16.msra.mxu0 %v3832_v35  ;;  %v3926_v35 = vld [vmem:[#allocation5 + $0x724] ss:$24 sps:$4 sm:$0xff]  }
  0xdf   :  { %2081 = vmatpush1.bf16.msra.mxu1 %v3835_v36  ;;  %1959 = vmatprep.subr.bf16.mxu0 %v3840_v37  ;;  %v3929_v36 = vld [vmem:[#allocation5 + $0x72c] ss:$24 sps:$4 sm:$0xff]   ;;  %v3924_v37 = vld [vmem:[#allocation5 + $0x720] ss:$24 sps:$4 sm:$0xff]  }
  0xe0   :  { %2082 = vmatprep.subr.bf16.mxu1 %v3843_v38  ;;  %v3927_v38 = vld [vmem:[#allocation5 + $0x728] ss:$24 sps:$4 sm:$0xff]  }
  0xe2   :  { %1960 = vmatpush1.bf16.msra.mxu0 %v3838_v39  ;;  %v3932_v39 = vld [vmem:[#allocation5 + $0x754] ss:$24 sps:$4 sm:$0xff]  }
  0xe3   :  { %2083 = vmatpush1.bf16.msra.mxu1 %v3841_v40  ;;  %1961 = vmatprep.subr.bf16.mxu0 %v3846_v41  ;;  %v3935_v40 = vld [vmem:[#allocation5 + $0x75c] ss:$24 sps:$4 sm:$0xff]   ;;  %v3930_v41 = vld [vmem:[#allocation5 + $0x750] ss:$24 sps:$4 sm:$0xff]  }
  0xe4   :  { %2084 = vmatprep.subr.bf16.mxu1 %v3849_v42  ;;  %v3933_v42 = vld [vmem:[#allocation5 + $0x758] ss:$24 sps:$4 sm:$0xff]  }
  0xe6   :  { %1962 = vmatpush1.bf16.msra.mxu0 %v3844_v43  ;;  %v3938_v43 = vld [vmem:[#allocation5 + $0x784] ss:$24 sps:$4 sm:$0xff]  }
  0xe7   :  { %2085 = vmatpush1.bf16.msra.mxu1 %v3847_v44  ;;  %1963 = vmatprep.subr.bf16.mxu0 %v3852_v45  ;;  %v3941_v44 = vld [vmem:[#allocation5 + $0x78c] ss:$24 sps:$4 sm:$0xff]   ;;  %v3936_v45 = vld [vmem:[#allocation5 + $0x780] ss:$24 sps:$4 sm:$0xff]  }
  0xe8   :  { %2086 = vmatprep.subr.bf16.mxu1 %v3855_v46  ;;  %v3939_v46 = vld [vmem:[#allocation5 + $0x788] ss:$24 sps:$4 sm:$0xff]  }
  0xea   :  { %1964 = vmatpush1.bf16.msra.mxu0 %v3850_v47  ;;  %v3944_v47 = vld [vmem:[#allocation5 + $0x7b4] ss:$24 sps:$4 sm:$0xff]  }
  0xeb   :  { %2087 = vmatpush1.bf16.msra.mxu1 %v3853_v49  ;;  %1965 = vmatprep.subr.bf16.mxu0 %v3858_v50  ;;  %v3947_v49 = vld [vmem:[#allocation5 + $0x7bc] ss:$24 sps:$4 sm:$0xff]   ;;  %v3942_v50 = vld [vmem:[#allocation5 + $0x7b0] ss:$24 sps:$4 sm:$0xff]  }
  0xec   :  { %2088 = vmatprep.subr.bf16.mxu1 %v3861_v51  ;;  %v3945_v51 = vld [vmem:[#allocation5 + $0x7b8] ss:$24 sps:$4 sm:$0xff]  }
  0xee   :  { %1966 = vmatpush1.bf16.msra.mxu0 %v3856_v52  ;;  %v3950_v52 = vld [vmem:[#allocation5 + $0x7e4] ss:$24 sps:$4 sm:$0xff]  }
  0xef   :  { %2089 = vmatpush1.bf16.msra.mxu1 %v3859_v53  ;;  %1967 = vmatprep.subr.bf16.mxu0 %v3864_v54  ;;  %v3953_v53 = vld [vmem:[#allocation5 + $0x7ec] ss:$24 sps:$4 sm:$0xff]   ;;  %v3948_v54 = vld [vmem:[#allocation5 + $0x7e0] ss:$24 sps:$4 sm:$0xff]  }
  0xf0   :  { %2090 = vmatprep.subr.bf16.mxu1 %v3867_v55  ;;  %v3951_v55 = vld [vmem:[#allocation5 + $0x7e8] ss:$24 sps:$4 sm:$0xff]  }
  0xf2   :  { %1968 = vmatpush1.bf16.msra.mxu0 %v3862_v56  ;;  %v3956_v56 = vld [vmem:[#allocation5 + $0x814] ss:$24 sps:$4 sm:$0xff]  }
  0xf3   :  { %2091 = vmatpush1.bf16.msra.mxu1 %v3865_v57  ;;  %1969 = vmatprep.subr.bf16.mxu0 %v3870_v58  ;;  %v3959_v57 = vld [vmem:[#allocation5 + $0x81c] ss:$24 sps:$4 sm:$0xff]   ;;  %v3954_v58 = vld [vmem:[#allocation5 + $0x810] ss:$24 sps:$4 sm:$0xff]  }
  0xf4   :  { %2092 = vmatprep.subr.bf16.mxu1 %v3873_v59  ;;  %v3957_v59 = vld [vmem:[#allocation5 + $0x818] ss:$24 sps:$4 sm:$0xff]  }
  0xf6   :  { %1970 = vmatpush1.bf16.msra.mxu0 %v3868_v60  ;;  %v3962_v60 = vld [vmem:[#allocation5 + $0x844] ss:$24 sps:$4 sm:$0xff]  }
  0xf7   :  { %2093 = vmatpush1.bf16.msra.mxu1 %v3871_v61  ;;  %1971 = vmatprep.subr.bf16.mxu0 %v3876_v62  ;;  %v3965_v61 = vld [vmem:[#allocation5 + $0x84c] ss:$24 sps:$4 sm:$0xff]   ;;  %v3960_v62 = vld [vmem:[#allocation5 + $0x840] ss:$24 sps:$4 sm:$0xff]  }
  0xf8   :  { %2094 = vmatprep.subr.bf16.mxu1 %v3879_v63  ;;  %v3963_v63 = vld [vmem:[#allocation5 + $0x848] ss:$24 sps:$4 sm:$0xff]  }
  0xfa   :  { %1972 = vmatpush1.bf16.msra.mxu0 %v3874_v0  ;;  %v3968_v0 = vld [vmem:[#allocation5 + $0x874] ss:$24 sps:$4 sm:$0xff]  }
  0xfb   :  { %2095 = vmatpush1.bf16.msra.mxu1 %v3877_v1  ;;  %1973 = vmatprep.subr.bf16.mxu0 %v3882_v2  ;;  %v3971_v1 = vld [vmem:[#allocation5 + $0x87c] ss:$24 sps:$4 sm:$0xff]   ;;  %v3966_v2 = vld [vmem:[#allocation5 + $0x870] ss:$24 sps:$4 sm:$0xff]  }
  0xfc   :  { %2096 = vmatprep.subr.bf16.mxu1 %v3885_v3  ;;  %v3969_v3 = vld [vmem:[#allocation5 + $0x878] ss:$24 sps:$4 sm:$0xff]  }
  0xfe   :  { %1974 = vmatpush1.bf16.msra.mxu0 %v3880_v4  ;;  %v3974_v4 = vld [vmem:[#allocation5 + $0x8a4] ss:$24 sps:$4 sm:$0xff]  }
  0xff   :  { %2097 = vmatpush1.bf16.msra.mxu1 %v3883_v6  ;;  %1984 = vmatprep.subr.bf16.mxu0 %v3890_v7  ;;  %v3977_v6 = vld [vmem:[#allocation5 + $0x8ac] ss:$24 sps:$4 sm:$0xff]   ;;  %v3972_v7 = vld [vmem:[#allocation5 + $0x8a0] ss:$24 sps:$4 sm:$0xff]  }
 0x100   :  { %2107 = vmatprep.subr.bf16.mxu1 %v3893_v8  ;;  %v3975_v8 = vld [vmem:[#allocation5 + $0x8a8] ss:$24 sps:$4 sm:$0xff]  }
 0x101   :  { %1976 = vmatmul.mubr.bf16.vlgmr.msra.gmra.mrb[0].mxu0 %v4674_v9 }
 0x102   :  { %2099 = vmatmul.mubr.bf16.vlgmr.msra.gmra.mrb[0].mxu1 %v4674_v9  ;;  %1985 = vmatpush1.bf16.msra.mxu0 %v3888_v10  ;;  %v3980_v10 = vld [vmem:[#allocation5 + $0x8d4] ss:$24 sps:$4 sm:$0xff]  }
 0x103   :  { %2108 = vmatpush1.bf16.msra.mxu1 %v3891_v11  ;;  %1986 = vmatprep.subr.bf16.mxu0 %v3896_v12  ;;  %v3983_v11 = vld [vmem:[#allocation5 + $0x8dc] ss:$24 sps:$4 sm:$0xff]   ;;  %v3978_v12 = vld [vmem:[#allocation5 + $0x8d0] ss:$24 sps:$4 sm:$0xff]  }
 0x104   :  { %2109 = vmatprep.subr.bf16.mxu1 %v3899_v14  ;;  %2016 = vmatprep.mubr.bf16.mxu0 %v4680_v15  ;;  %v3981_v14 = vld [vmem:[#allocation5 + $0x8d8] ss:$24 sps:$4 sm:$0xff]  }
 0x105   :  { %2139 = vmatprep.mubr.bf16.mxu1 %v4680_v15 }
 0x106   :  { %1987 = vmatpush1.bf16.msra.mxu0 %v3894_v16  ;;  %v3988_v16 = vld [vmem:[#allocation5 + $0x14] ss:$24 sps:$4 sm:$0xff]  }
 0x107   :  { %2110 = vmatpush1.bf16.msra.mxu1 %v3897_v17  ;;  %1988 = vmatprep.subr.bf16.mxu0 %v3902_v18  ;;  %v4688_v17 = vcombine.low %v4676_v13, %v4676_v13  ;;  %v3986_v18 = vld [vmem:[#allocation5 + $0x10] ss:$24 sps:$4 sm:$0xff]   ;;  %v3995_v13 = vld [vmem:[#allocation5 + $0xa0] ss:$24 sps:$4 sm:$0xff]  }
 0x108   :  { %2111 = vmatprep.subr.bf16.mxu1 %v3905_v19  ;;  %v3991_v19 = vld [vmem:[#allocation5 + $0x44] ss:$24 sps:$4 sm:$0xff]  }
 0x10a   :  { %1989 = vmatpush1.bf16.msra.mxu0 %v3900_v20  ;;  %v3989_v20 = vld [vmem:[#allocation5 + $0x40] ss:$24 sps:$4 sm:$0xff]  }
 0x10b   :  { %2112 = vmatpush1.bf16.msra.mxu1 %v3903_v21  ;;  %1990 = vmatprep.subr.bf16.mxu0 %v3908_v22  ;;  %v3994_v21 = vld [vmem:[#allocation5 + $0x74] ss:$24 sps:$4 sm:$0xff]   ;;  %v3992_v22 = vld [vmem:[#allocation5 + $0x70] ss:$24 sps:$4 sm:$0xff]  }
 0x10c   :  { %2113 = vmatprep.subr.bf16.mxu1 %v3911_v23  ;;  %v3997_v23 = vld [vmem:[#allocation5 + $0xa4] ss:$24 sps:$4 sm:$0xff]  }
 0x10e   :  { %1991 = vmatpush1.bf16.msra.mxu0 %v3906_v24  ;;  %v4000_v24 = vld [vmem:[#allocation5 + $0xd4] ss:$24 sps:$4 sm:$0xff]  }
 0x10f   :  { %2114 = vmatpush1.bf16.msra.mxu1 %v3909_v25  ;;  %1992 = vmatprep.subr.bf16.mxu0 %v3914_v26  ;;  %v3998_v25 = vld [vmem:[#allocation5 + $0xd0] ss:$24 sps:$4 sm:$0xff]   ;;  %v4003_v26 = vld [vmem:[#allocation5 + $0x104] ss:$24 sps:$4 sm:$0xff]  }
 0x110   :  { %2115 = vmatprep.subr.bf16.mxu1 %v3917_v27  ;;  %v4001_v27 = vld [vmem:[#allocation5 + $0x100] ss:$24 sps:$4 sm:$0xff]  }
 0x112   :  { %1993 = vmatpush1.bf16.msra.mxu0 %v3912_v28  ;;  %v4006_v28 = vld [vmem:[#allocation5 + $0x134] ss:$24 sps:$4 sm:$0xff]  }
 0x113   :  { %2116 = vmatpush1.bf16.msra.mxu1 %v3915_v29  ;;  %1994 = vmatprep.subr.bf16.mxu0 %v3920_v31  ;;  %v4004_v29 = vld [vmem:[#allocation5 + $0x130] ss:$24 sps:$4 sm:$0xff]   ;;  %v4007_v31 = vld [vmem:[#allocation5 + $0x160] ss:$24 sps:$4 sm:$0xff]  }
 0x114   :  { %2117 = vmatprep.subr.bf16.mxu1 %v3923_v32  ;;  %v4012_v32 = vld [vmem:[#allocation5 + $0x194] ss:$24 sps:$4 sm:$0xff]  }
 0x116   :  { %1995 = vmatpush1.bf16.msra.mxu0 %v3918_v33  ;;  %v4010_v33 = vld [vmem:[#allocation5 + $0x190] ss:$24 sps:$4 sm:$0xff]  }
 0x117   :  { %2118 = vmatpush1.bf16.msra.mxu1 %v3921_v34  ;;  %1996 = vmatprep.subr.bf16.mxu0 %v3926_v35  ;;  %v4015_v34 = vld [vmem:[#allocation5 + $0x1c4] ss:$24 sps:$4 sm:$0xff]   ;;  %v4013_v35 = vld [vmem:[#allocation5 + $0x1c0] ss:$24 sps:$4 sm:$0xff]  }
 0x118   :  { %2119 = vmatprep.subr.bf16.mxu1 %v3929_v36  ;;  %v4018_v36 = vld [vmem:[#allocation5 + $0x1f4] ss:$24 sps:$4 sm:$0xff]  }
 0x11a   :  { %1997 = vmatpush1.bf16.msra.mxu0 %v3924_v37  ;;  %v4112_v37 = vld [vmem:[#allocation8] ss:$8 sps:$4 sm:$0xff]  }
 0x11b   :  { %2120 = vmatpush1.bf16.msra.mxu1 %v3927_v38  ;;  %1998 = vmatprep.subr.bf16.mxu0 %v3932_v39  ;;  %v4114_v38 = vld [vmem:[#allocation8 + $0x4] ss:$8 sps:$4 sm:$0xff]  }
 0x11c   :  { %2121 = vmatprep.subr.bf16.mxu1 %v3935_v40  ;;  %v4016_v39 = vld [vmem:[#allocation5 + $0x1f0] ss:$24 sps:$4 sm:$0xff]   ;;  %v4021_v40 = vld [vmem:[#allocation5 + $0x224] ss:$24 sps:$4 sm:$0xff]  }
 0x11e   :  { %1999 = vmatpush1.bf16.msra.mxu0 %v3930_v41  ;;  %v4118_v41 = vld [vmem:[#allocation8 + $0x10] ss:$8 sps:$4 sm:$0xff]  }
 0x11f   :  { %2122 = vmatpush1.bf16.msra.mxu1 %v3933_v42  ;;  %2000 = vmatprep.subr.bf16.mxu0 %v3938_v43  ;;  %v4120_v42 = vld [vmem:[#allocation8 + $0x14] ss:$8 sps:$4 sm:$0xff]  }
 0x120   :  { %2123 = vmatprep.subr.bf16.mxu1 %v3941_v44  ;;  %v4019_v43 = vld [vmem:[#allocation5 + $0x220] ss:$24 sps:$4 sm:$0xff]   ;;  %v4024_v44 = vld [vmem:[#allocation5 + $0x254] ss:$24 sps:$4 sm:$0xff]  }
 0x122   :  { %2001 = vmatpush1.bf16.msra.mxu0 %v3936_v45  ;;  %v4124_v45 = vld [vmem:[#allocation8 + $0x20] ss:$8 sps:$4 sm:$0xff]  }
 0x123   :  { %2124 = vmatpush1.bf16.msra.mxu1 %v3939_v46  ;;  %2002 = vmatprep.subr.bf16.mxu0 %v3944_v47  ;;  %v4126_v46 = vld [vmem:[#allocation8 + $0x24] ss:$8 sps:$4 sm:$0xff]  }
 0x124   :  { %2125 = vmatprep.subr.bf16.mxu1 %v3947_v49  ;;  %v4022_v47 = vld [vmem:[#allocation5 + $0x250] ss:$24 sps:$4 sm:$0xff]   ;;  %v4027_v49 = vld [vmem:[#allocation5 + $0x284] ss:$24 sps:$4 sm:$0xff]  }
 0x126   :  { %2003 = vmatpush1.bf16.msra.mxu0 %v3942_v50  ;;  %v4130_v50 = vld [vmem:[#allocation8 + $0x30] ss:$8 sps:$4 sm:$0xff]  }
 0x127   :  { %2126 = vmatpush1.bf16.msra.mxu1 %v3945_v51  ;;  %2004 = vmatprep.subr.bf16.mxu0 %v3950_v52  ;;  %v4132_v51 = vld [vmem:[#allocation8 + $0x34] ss:$8 sps:$4 sm:$0xff]  }
 0x128   :  { %2127 = vmatprep.subr.bf16.mxu1 %v3953_v53  ;;  %v4025_v52 = vld [vmem:[#allocation5 + $0x280] ss:$24 sps:$4 sm:$0xff]   ;;  %v4030_v53 = vld [vmem:[#allocation5 + $0x2b4] ss:$24 sps:$4 sm:$0xff]  }
 0x12a   :  { %2005 = vmatpush1.bf16.msra.mxu0 %v3948_v54  ;;  %v4136_v54 = vld [vmem:[#allocation8 + $0x40] ss:$8 sps:$4 sm:$0xff]  }
 0x12b   :  { %2128 = vmatpush1.bf16.msra.mxu1 %v3951_v55  ;;  %2006 = vmatprep.subr.bf16.mxu0 %v3956_v56  ;;  %v4138_v55 = vld [vmem:[#allocation8 + $0x44] ss:$8 sps:$4 sm:$0xff]  }
 0x12c   :  { %2129 = vmatprep.subr.bf16.mxu1 %v3959_v57  ;;  %v4028_v56 = vld [vmem:[#allocation5 + $0x2b0] ss:$24 sps:$4 sm:$0xff]   ;;  %v4033_v57 = vld [vmem:[#allocation5 + $0x2e4] ss:$24 sps:$4 sm:$0xff]  }
 0x12e   :  { %2007 = vmatpush1.bf16.msra.mxu0 %v3954_v58  ;;  %v4142_v58 = vld [vmem:[#allocation8 + $0x50] ss:$8 sps:$4 sm:$0xff]  }
 0x12f   :  { %2130 = vmatpush1.bf16.msra.mxu1 %v3957_v59  ;;  %2008 = vmatprep.subr.bf16.mxu0 %v3962_v60  ;;  %v4144_v59 = vld [vmem:[#allocation8 + $0x54] ss:$8 sps:$4 sm:$0xff]  }
 0x130   :  { %2131 = vmatprep.subr.bf16.mxu1 %v3965_v61  ;;  %v4031_v60 = vld [vmem:[#allocation5 + $0x2e0] ss:$24 sps:$4 sm:$0xff]   ;;  %v4036_v61 = vld [vmem:[#allocation5 + $0x314] ss:$24 sps:$4 sm:$0xff]  }
 0x132   :  { %2009 = vmatpush1.bf16.msra.mxu0 %v3960_v62  ;;  %v4148_v62 = vld [vmem:[#allocation8 + $0x60] ss:$8 sps:$4 sm:$0xff]  }
 0x133   :  { %2132 = vmatpush1.bf16.msra.mxu1 %v3963_v63  ;;  %2010 = vmatprep.subr.bf16.mxu0 %v3968_v0  ;;  %v4150_v63 = vld [vmem:[#allocation8 + $0x64] ss:$8 sps:$4 sm:$0xff]  }
 0x134   :  { %2133 = vmatprep.subr.bf16.mxu1 %v3971_v1  ;;  %v4034_v0 = vld [vmem:[#allocation5 + $0x310] ss:$24 sps:$4 sm:$0xff]   ;;  %v4039_v1 = vld [vmem:[#allocation5 + $0x344] ss:$24 sps:$4 sm:$0xff]  }
 0x136   :  { %2011 = vmatpush1.bf16.msra.mxu0 %v3966_v2  ;;  %v4153_v2 = vld [vmem:[#allocation8 + $0x74] ss:$8 sps:$4 sm:$0xff]  }
 0x137   :  { %2134 = vmatpush1.bf16.msra.mxu1 %v3969_v3  ;;  %2012 = vmatprep.subr.bf16.mxu0 %v3974_v4  ;;  %v4151_v3 = vld [vmem:[#allocation8 + $0x70] ss:$8 sps:$4 sm:$0xff]   ;;  %v4156_v4 = vld [vmem:[#allocation8 + $0x84] ss:$8 sps:$4 sm:$0xff]  }
 0x138   :  { %2135 = vmatprep.subr.bf16.mxu1 %v3977_v6  ;;  %v4037_v6 = vld [vmem:[#allocation5 + $0x340] ss:$24 sps:$4 sm:$0xff]  }
 0x13a   :  { %2013 = vmatpush1.bf16.msra.mxu0 %v3972_v7  ;;  %v4042_v7 = vld [vmem:[#allocation5 + $0x374] ss:$24 sps:$4 sm:$0xff]  }
 0x13b   :  { %2136 = vmatpush1.bf16.msra.mxu1 %v3975_v8  ;;  %2014 = vmatprep.subr.bf16.mxu0 %v3980_v10  ;;  %v4154_v8 = vld [vmem:[#allocation8 + $0x80] ss:$8 sps:$4 sm:$0xff]   ;;  %v4159_v10 = vld [vmem:[#allocation8 + $0x94] ss:$8 sps:$4 sm:$0xff]  }
 0x13c   :  { %2137 = vmatprep.subr.bf16.mxu1 %v3983_v11  ;;  %v4040_v11 = vld [vmem:[#allocation5 + $0x370] ss:$24 sps:$4 sm:$0xff]  }
 0x13e   :  { %2015 = vmatpush1.bf16.msra.mxu0 %v3978_v12  ;;  %v4045_v12 = vld [vmem:[#allocation5 + $0x3a4] ss:$24 sps:$4 sm:$0xff]  }
 0x13f   :  { %2138 = vmatpush1.bf16.msra.mxu1 %v3981_v14  ;;  %2148 = vmatprep.subr.bf16.mxu0 %v3988_v16  ;;  %v4157_v14 = vld [vmem:[#allocation8 + $0x90] ss:$8 sps:$4 sm:$0xff]  }
 0x140   :  { %2871 = vmatprep.subr.bf16.mxu1 %v4114_v38  ;;  %v4043_v16 = vld [vmem:[#allocation5 + $0x3a0] ss:$24 sps:$4 sm:$0xff]  }
 0x141   :  { %2017 = vmatmul.mubr.bf16.vlgmr.msra.gmra.mrb[0].mxu0 %v4688_v17  ;;  %v4061_v38 = vld [vmem:[#allocation5 + $0x4c0] ss:$24 sps:$4 sm:$0xff]  }
 0x142   :  { %2140 = vmatmul.mubr.bf16.vlgmr.msra.gmra.mrb[0].mxu1 %v4688_v17  ;;  %2149 = vmatpush1.bf16.msra.mxu0 %v3986_v18  ;;  %v4048_v18 = vld [vmem:[#allocation5 + $0x3d4] ss:$24 sps:$4 sm:$0xff]  }
 0x143   :  { %2180 = vmatprep.mubr.bf16.mxu0 %v4656_v48  ;;  %2150 = vmatprep.subr.bf16.mxu0 %v3991_v19  ;;  %v4009_v48 = vld [vmem:[#allocation5 + $0x164] ss:$24 sps:$4 sm:$0xff]  }
 0x144   :  { %2872 = vmatpush1.bf16.msra.mxu1 %v4112_v37  ;;  %v4165_v19 = vld [vmem:[#allocation8 + $0xb4] ss:$8 sps:$4 sm:$0xff]   ;;  %v4175_v37 = vld [vmem:[#allocation8 + $0xf0] ss:$8 sps:$4 sm:$0xff]  }
 0x145   :  { %2873 = vmatprep.subr.bf16.mxu1 %v4120_v42  ;;  %v4069_v42 = vld [vmem:[#allocation5 + $0x524] ss:$24 sps:$4 sm:$0xff]  }
 0x146   :  { %2151 = vmatpush1.bf16.msra.mxu0 %v3989_v20  ;;  %v4046_v20 = vld [vmem:[#allocation5 + $0x3d0] ss:$24 sps:$4 sm:$0xff]  }
 0x147   :  { %2152 = vmatprep.subr.bf16.mxu0 %v3994_v21  ;;  %v4051_v21 = vld [vmem:[#allocation5 + $0x404] ss:$24 sps:$4 sm:$0xff]  }
 0x148   :  { %2874 = vmatpush1.bf16.msra.mxu1 %v4118_v41  ;;  %v4064_v41 = vld [vmem:[#allocation5 + $0x4f0] ss:$24 sps:$4 sm:$0xff]  }
 0x149   :  { %2875 = vmatprep.subr.bf16.mxu1 %v4126_v46  ;;  %v4075_v46 = vld [vmem:[#allocation5 + $0x584] ss:$24 sps:$4 sm:$0xff]  }
 0x14a   :  { %2153 = vmatpush1.bf16.msra.mxu0 %v3992_v22  ;;  %v4163_v22 = vld [vmem:[#allocation8 + $0xb0] ss:$8 sps:$4 sm:$0xff]  }
 0x14b   :  { %2154 = vmatprep.subr.bf16.mxu0 %v3997_v23  ;;  %v4049_v23 = vld [vmem:[#allocation5 + $0x400] ss:$24 sps:$4 sm:$0xff]  }
 0x14c   :  { %2876 = vmatpush1.bf16.msra.mxu1 %v4124_v45  ;;  %v4070_v45 = vld [vmem:[#allocation5 + $0x550] ss:$24 sps:$4 sm:$0xff]  }
 0x14d   :  { %2877 = vmatprep.subr.bf16.mxu1 %v4132_v51  ;;  %v4081_v51 = vld [vmem:[#allocation5 + $0x5e4] ss:$24 sps:$4 sm:$0xff]  }
 0x14e   :  { %2155 = vmatpush1.bf16.msra.mxu0 %v3995_v13  ;;  %v4054_v13 = vld [vmem:[#allocation5 + $0x434] ss:$24 sps:$4 sm:$0xff]  }
 0x14f   :  { %2156 = vmatprep.subr.bf16.mxu0 %v4000_v24  ;;  %v4168_v24 = vld [vmem:[#allocation8 + $0xc4] ss:$8 sps:$4 sm:$0xff]  }
 0x150   :  { %2878 = vmatpush1.bf16.msra.mxu1 %v4130_v50  ;;  %v4076_v50 = vld [vmem:[#allocation5 + $0x5b0] ss:$24 sps:$4 sm:$0xff]  }
 0x151   :  { %2879 = vmatprep.subr.bf16.mxu1 %v4138_v55  ;;  %v4087_v55 = vld [vmem:[#allocation5 + $0x644] ss:$24 sps:$4 sm:$0xff]  }
 0x152   :  { %2157 = vmatpush1.bf16.msra.mxu0 %v3998_v25  ;;  %v4166_v25 = vld [vmem:[#allocation8 + $0xc0] ss:$8 sps:$4 sm:$0xff]  }
 0x153   :  { %2158 = vmatprep.subr.bf16.mxu0 %v4003_v26  ;;  %v4052_v26 = vld [vmem:[#allocation5 + $0x430] ss:$24 sps:$4 sm:$0xff]  }
 0x154   :  { %2880 = vmatpush1.bf16.msra.mxu1 %v4136_v54  ;;  %v4082_v54 = vld [vmem:[#allocation5 + $0x610] ss:$24 sps:$4 sm:$0xff]  }
 0x155   :  { %2881 = vmatprep.subr.bf16.mxu1 %v4144_v59  ;;  %v4093_v59 = vld [vmem:[#allocation5 + $0x6a4] ss:$24 sps:$4 sm:$0xff]  }
 0x156   :  { %2159 = vmatpush1.bf16.msra.mxu0 %v4001_v27  ;;  %v4057_v27 = vld [vmem:[#allocation5 + $0x464] ss:$24 sps:$4 sm:$0xff]  }
 0x157   :  { %2160 = vmatprep.subr.bf16.mxu0 %v4006_v28  ;;  %v4171_v28 = vld [vmem:[#allocation8 + $0xd4] ss:$8 sps:$4 sm:$0xff]  }
 0x158   :  { %2882 = vmatpush1.bf16.msra.mxu1 %v4142_v58  ;;  %v4088_v58 = vld [vmem:[#allocation5 + $0x670] ss:$24 sps:$4 sm:$0xff]  }
 0x159   :  { %2883 = vmatprep.subr.bf16.mxu1 %v4150_v63  ;;  %v4099_v63 = vld [vmem:[#allocation5 + $0x704] ss:$24 sps:$4 sm:$0xff]  }
 0x15a   :  { %2161 = vmatpush1.bf16.msra.mxu0 %v4004_v29  ;;  %v4169_v29 = vld [vmem:[#allocation8 + $0xd0] ss:$8 sps:$4 sm:$0xff]  }
 0x15b   :  { %2162 = vmatprep.subr.bf16.mxu0 %v4009_v48  ;;  %v4055_v48 = vld [vmem:[#allocation5 + $0x460] ss:$24 sps:$4 sm:$0xff]  }
 0x15c   :  { %2884 = vmatpush1.bf16.msra.mxu1 %v4148_v62  ;;  %v4094_v62 = vld [vmem:[#allocation5 + $0x6d0] ss:$24 sps:$4 sm:$0xff]  }
 0x15d   :  { %2885 = vmatprep.subr.bf16.mxu1 %v4153_v2  ;;  %v4103_v2 = vld [vmem:[#allocation5 + $0x760] ss:$24 sps:$4 sm:$0xff]  }
 0x15e   :  { %2163 = vmatpush1.bf16.msra.mxu0 %v4007_v31  ;;  %v4060_v31 = vld [vmem:[#allocation5 + $0x494] ss:$24 sps:$4 sm:$0xff]  }
 0x15f   :  { %2164 = vmatprep.subr.bf16.mxu0 %v4012_v32  ;;  %v4174_v32 = vld [vmem:[#allocation8 + $0xe4] ss:$8 sps:$4 sm:$0xff]  }
 0x160   :  { %2886 = vmatpush1.bf16.msra.mxu1 %v4151_v3  ;;  %v4108_v3 = vld [vmem:[#allocation5 + $0x794] ss:$24 sps:$4 sm:$0xff]  }
 0x161   :  { %2887 = vmatprep.subr.bf16.mxu1 %v4156_v4  ;;  %v4106_v4 = vld [vmem:[#allocation5 + $0x790] ss:$24 sps:$4 sm:$0xff]  }
 0x162   :  { %2165 = vmatpush1.bf16.msra.mxu0 %v4010_v33  ;;  %v4172_v33 = vld [vmem:[#allocation8 + $0xe0] ss:$8 sps:$4 sm:$0xff]  }
 0x163   :  { %2166 = vmatprep.subr.bf16.mxu0 %v4015_v34  ;;  %v4058_v34 = vld [vmem:[#allocation5 + $0x490] ss:$24 sps:$4 sm:$0xff]  }
 0x164   :  { %2888 = vmatpush1.bf16.msra.mxu1 %v4154_v8  ;;  %v4117_v8 = vld [vmem:[#allocation5 + $0x7f4] ss:$24 sps:$4 sm:$0xff]  }
 0x165   :  { %2889 = vmatprep.subr.bf16.mxu1 %v4159_v10  ;;  %v4115_v10 = vld [vmem:[#allocation5 + $0x7f0] ss:$24 sps:$4 sm:$0xff]  }
 0x166   :  { %2167 = vmatpush1.bf16.msra.mxu0 %v4013_v35  ;;  %v4063_v35 = vld [vmem:[#allocation5 + $0x4c4] ss:$24 sps:$4 sm:$0xff]  }
 0x167   :  { %2168 = vmatprep.subr.bf16.mxu0 %v4018_v36  ;;  %v4177_v36 = vld [vmem:[#allocation8 + $0xf4] ss:$8 sps:$4 sm:$0xff]  }
 0x168   :  { %2890 = vmatpush1.bf16.msra.mxu1 %v4157_v14  ;;  %v4129_v14 = vld [vmem:[#allocation5 + $0x854] ss:$24 sps:$4 sm:$0xff]  }
 0x16a   :  { %2169 = vmatpush1.bf16.msra.mxu0 %v4016_v39  ;;  %v4066_v39 = vld [vmem:[#allocation5 + $0x4f4] ss:$24 sps:$4 sm:$0xff]  }
 0x16b   :  { %2170 = vmatprep.subr.bf16.mxu0 %v4021_v40  ;;  %v4180_v40 = vld [vmem:[#allocation8 + $0x104] ss:$8 sps:$4 sm:$0xff]  }
 0x16e   :  { %2171 = vmatpush1.bf16.msra.mxu0 %v4019_v43  ;;  %v4067_v43 = vld [vmem:[#allocation5 + $0x520] ss:$24 sps:$4 sm:$0xff]  }
 0x16f   :  { %2172 = vmatprep.subr.bf16.mxu0 %v4024_v44  ;;  %v4072_v44 = vld [vmem:[#allocation5 + $0x554] ss:$24 sps:$4 sm:$0xff]  }
 0x172   :  { %2173 = vmatpush1.bf16.msra.mxu0 %v4022_v47  ;;  %v4073_v47 = vld [vmem:[#allocation5 + $0x580] ss:$24 sps:$4 sm:$0xff]  }
 0x173   :  { %2174 = vmatprep.subr.bf16.mxu0 %v4027_v49  ;;  %v4078_v49 = vld [vmem:[#allocation5 + $0x5b4] ss:$24 sps:$4 sm:$0xff]  }
 0x176   :  { %2175 = vmatpush1.bf16.msra.mxu0 %v4025_v52  ;;  %v4079_v52 = vld [vmem:[#allocation5 + $0x5e0] ss:$24 sps:$4 sm:$0xff]  }
 0x177   :  { %2176 = vmatprep.subr.bf16.mxu0 %v4030_v53  ;;  %v4084_v53 = vld [vmem:[#allocation5 + $0x614] ss:$24 sps:$4 sm:$0xff]  }
 0x17a   :  { %2177 = vmatpush1.bf16.msra.mxu0 %v4028_v56  ;;  %v4085_v56 = vld [vmem:[#allocation5 + $0x640] ss:$24 sps:$4 sm:$0xff]  }
 0x17b   :  { %2178 = vmatprep.subr.bf16.mxu0 %v4033_v57  ;;  %v4090_v57 = vld [vmem:[#allocation5 + $0x674] ss:$24 sps:$4 sm:$0xff]  }
 0x17e   :  { %2179 = vmatpush1.bf16.msra.mxu0 %v4031_v60  ;;  %v4091_v60 = vld [vmem:[#allocation5 + $0x6a0] ss:$24 sps:$4 sm:$0xff]  }
 0x17f   :  { %2189 = vmatprep.subr.bf16.mxu0 %v4036_v61  ;;  %v4096_v61 = vld [vmem:[#allocation5 + $0x6d4] ss:$24 sps:$4 sm:$0xff]  }
 0x181   :  { %2181 = vmatmul.mubr.bf16.vlgmr.msra.gmra.mrb[4].mxu0 %v4660_v5  ;;  %v4162_v5 = vld [vmem:[#allocation8 + $0xa4] ss:$8 sps:$4 sm:$0xff]  }
 0x182   :  { %2190 = vmatpush1.bf16.msra.mxu0 %v4034_v0  ;;  %2221 = vmatprep.mubr.bf16.mxu0 %v4668_v30  ;;  %v4160_v30 = vld [vmem:[#allocation8 + $0xa0] ss:$8 sps:$4 sm:$0xff]  }
 0x183   :  { %2191 = vmatprep.subr.bf16.mxu0 %v4039_v1  ;;  %2891 = vmatprep.subr.bf16.mxu1 %v4162_v5  ;;  %v4102_v0 = vld [vmem:[#allocation5 + $0x734] ss:$24 sps:$4 sm:$0xff]   ;;  %v4105_v1 = vld [vmem:[#allocation5 + $0x764] ss:$24 sps:$4 sm:$0xff]   ;;  %v4127_v5 = vld [vmem:[#allocation5 + $0x850] ss:$24 sps:$4 sm:$0xff]  }
 0x184   :  { %2892 = vmatpush1.bf16.msra.mxu1 %v4160_v30  ;;  %v4141_v30 = vld [vmem:[#allocation5 + $0x8b4] ss:$24 sps:$4 sm:$0xff]  }
 0x185   :  { %2893 = vmatprep.subr.bf16.mxu1 %v4165_v19  ;;  %v4139_v19 = vld [vmem:[#allocation5 + $0x8b0] ss:$24 sps:$4 sm:$0xff]  }
 0x186   :  { %2192 = vmatpush1.bf16.msra.mxu0 %v4037_v6  ;;  %v4111_v6 = vld [vmem:[#allocation5 + $0x7c4] ss:$24 sps:$4 sm:$0xff]  }
 0x187   :  { %2193 = vmatprep.subr.bf16.mxu0 %v4042_v7  ;;  %v4109_v7 = vld [vmem:[#allocation5 + $0x7c0] ss:$24 sps:$4 sm:$0xff]  }
 0x188   :  { %2894 = vmatpush1.bf16.msra.mxu1 %v4163_v22  ;;  %v411_v22 = vlaneseq }
 0x189   :  { %2895 = vmatprep.subr.bf16.mxu1 %v4168_v24  ;;  %v4701_v24 = vld [vmem:[#allocation7] sm:$0x3f] }
 0x18a   :  { %2194 = vmatpush1.bf16.msra.mxu0 %v4040_v11  ;;  %v4123_v11 = vld [vmem:[#allocation5 + $0x824] ss:$24 sps:$4 sm:$0xff]  }
 0x18b   :  { %2195 = vmatprep.subr.bf16.mxu0 %v4045_v12  ;;  %v4121_v12 = vld [vmem:[#allocation5 + $0x820] ss:$24 sps:$4 sm:$0xff]  }
 0x18c   :  { %2896 = vmatpush1.bf16.msra.mxu1 %v4166_v25 }
 0x18d   :  { %2897 = vmatprep.subr.bf16.mxu1 %v4171_v28 }
 0x18e   :  { %2196 = vmatpush1.bf16.msra.mxu0 %v4043_v16  ;;  %v4135_v16 = vld [vmem:[#allocation5 + $0x884] ss:$24 sps:$4 sm:$0xff]  }
 0x18f   :  { %2197 = vmatprep.subr.bf16.mxu0 %v4048_v18  ;;  %v4133_v18 = vld [vmem:[#allocation5 + $0x880] ss:$24 sps:$4 sm:$0xff]  }
 0x190   :  { %2898 = vmatpush1.bf16.msra.mxu1 %v4169_v29 }
 0x191   :  { %2899 = vmatprep.subr.bf16.mxu1 %v4174_v32 }
 0x192   :  { %2198 = vmatpush1.bf16.msra.mxu0 %v4046_v20  ;;  %v4147_v20 = vld [vmem:[#allocation5 + $0x8e4] ss:$24 sps:$4 sm:$0xff]  }
 0x193   :  { %2199 = vmatprep.subr.bf16.mxu0 %v4051_v21  ;;  %v4145_v21 = vld [vmem:[#allocation5 + $0x8e0] ss:$24 sps:$4 sm:$0xff]  }
 0x194   :  { %2900 = vmatpush1.bf16.msra.mxu1 %v4172_v33 }
 0x195   :  { %2901 = vmatprep.subr.bf16.mxu1 %v4177_v36 }
 0x196   :  { %2200 = vmatpush1.bf16.msra.mxu0 %v4049_v23  ;;  %v4698_v23 = vshrl.u32 %v411_v22, 7  ;;  %v4231_v22 = vld [vmem:[#allocation8 + $0x214] ss:$8 sps:$4 sm:$0xff]  }
 0x197   :  { %2201 = vmatprep.subr.bf16.mxu0 %v4054_v13 }
 0x198   :  { %2902 = vmatpush1.bf16.msra.mxu1 %v4175_v37  ;;  %v413_v13 = vsub.s32 0, %v4698_v23  ;;  %v417_v25 = vsub.s32 1, %v4698_v23 }
 0x199   :  { %2912 = vmatprep.subr.bf16.mxu1 %v4180_v40 }
 0x19a   :  { %2202 = vmatpush1.bf16.msra.mxu0 %v4052_v26  ;;  %v425_v26 = vsub.s32 3, %v4698_v23  ;;  %v418_v28 = vrot.slane %v4701_v24, %v417_v25 }
 0x19b   :  { %2203 = vmatprep.subr.bf16.mxu0 %v4057_v27  ;;  %v414_v27 = vrot.slane %v4701_v24, %v413_v13 }
 0x19e   :  { %2204 = vmatpush1.bf16.msra.mxu0 %v4055_v48 }
 0x19f   :  { %2205 = vmatprep.subr.bf16.mxu0 %v4060_v31 }
 0x1a2   :  { %2206 = vmatpush1.bf16.msra.mxu0 %v4058_v34 }
 0x1a3   :  { %2207 = vmatprep.subr.bf16.mxu0 %v4063_v35 }
 0x1a6   :  { %2208 = vmatpush1.bf16.msra.mxu0 %v4061_v38 }
 0x1a7   :  { %2209 = vmatprep.subr.bf16.mxu0 %v4066_v39 }
 0x1aa   :  { %2210 = vmatpush1.bf16.msra.mxu0 %v4064_v41 }
 0x1ab   :  { %2211 = vmatprep.subr.bf16.mxu0 %v4069_v42 }
 0x1ae   :  { %2212 = vmatpush1.bf16.msra.mxu0 %v4067_v43 }
 0x1af   :  { %2213 = vmatprep.subr.bf16.mxu0 %v4072_v44  ;;  %v4178_v44 = vld [vmem:[#allocation8 + $0x100] ss:$8 sps:$4 sm:$0xff]  }
 0x1b2   :  { %2214 = vmatpush1.bf16.msra.mxu0 %v4070_v45 }
 0x1b3   :  { %2215 = vmatprep.subr.bf16.mxu0 %v4075_v46 }
 0x1b6   :  { %2216 = vmatpush1.bf16.msra.mxu0 %v4073_v47  ;;  %v4183_v47 = vld [vmem:[#allocation8 + $0x114] ss:$8 sps:$4 sm:$0xff]  }
 0x1b7   :  { %2217 = vmatprep.subr.bf16.mxu0 %v4078_v49  ;;  %v4181_v49 = vld [vmem:[#allocation8 + $0x110] ss:$8 sps:$4 sm:$0xff]  }
 0x1ba   :  { %2218 = vmatpush1.bf16.msra.mxu0 %v4076_v50  ;;  %v4186_v50 = vld [vmem:[#allocation8 + $0x124] ss:$8 sps:$4 sm:$0xff]  }
 0x1bb   :  { %2219 = vmatprep.subr.bf16.mxu0 %v4081_v51  ;;  %v4184_v51 = vld [vmem:[#allocation8 + $0x120] ss:$8 sps:$4 sm:$0xff]  }
 0x1be   :  { %2220 = vmatpush1.bf16.msra.mxu0 %v4079_v52  ;;  %v4189_v52 = vld [vmem:[#allocation8 + $0x134] ss:$8 sps:$4 sm:$0xff]  }
 0x1bf   :  { %2230 = vmatprep.subr.bf16.mxu0 %v4084_v53  ;;  %v4187_v53 = vld [vmem:[#allocation8 + $0x130] ss:$8 sps:$4 sm:$0xff]  }
 0x1c1   :  { %2222 = vmatmul.mubr.bf16.vlgmr.msra.gmra.mrb[4].mxu0 %v4674_v9  ;;  %v4097_v9 = vld [vmem:[#allocation5 + $0x700] ss:$24 sps:$4 sm:$0xff]  }
 0x1c2   :  { %2231 = vmatpush1.bf16.msra.mxu0 %v4082_v54  ;;  %2262 = vmatprep.mubr.bf16.mxu0 %v4680_v15  ;;  %v4100_v15 = vld [vmem:[#allocation5 + $0x730] ss:$24 sps:$4 sm:$0xff]  }
 0x1c3   :  { %2232 = vmatprep.subr.bf16.mxu0 %v4087_v55  ;;  %v4192_v54 = vld [vmem:[#allocation8 + $0x144] ss:$8 sps:$4 sm:$0xff]   ;;  %v4190_v55 = vld [vmem:[#allocation8 + $0x140] ss:$8 sps:$4 sm:$0xff]  }
 0x1c6   :  { %2233 = vmatpush1.bf16.msra.mxu0 %v4085_v56  ;;  %v4195_v56 = vld [vmem:[#allocation8 + $0x154] ss:$8 sps:$4 sm:$0xff]  }
 0x1c7   :  { %2234 = vmatprep.subr.bf16.mxu0 %v4090_v57  ;;  %v4193_v57 = vld [vmem:[#allocation8 + $0x150] ss:$8 sps:$4 sm:$0xff]  }
 0x1ca   :  { %2235 = vmatpush1.bf16.msra.mxu0 %v4088_v58  ;;  %v4198_v58 = vld [vmem:[#allocation8 + $0x164] ss:$8 sps:$4 sm:$0xff]  }
 0x1cb   :  { %2236 = vmatprep.subr.bf16.mxu0 %v4093_v59  ;;  %v4196_v59 = vld [vmem:[#allocation8 + $0x160] ss:$8 sps:$4 sm:$0xff]  }
 0x1ce   :  { %2237 = vmatpush1.bf16.msra.mxu0 %v4091_v60  ;;  %v4201_v60 = vld [vmem:[#allocation8 + $0x174] ss:$8 sps:$4 sm:$0xff]  }
 0x1cf   :  { %2238 = vmatprep.subr.bf16.mxu0 %v4096_v61  ;;  %v4199_v61 = vld [vmem:[#allocation8 + $0x170] ss:$8 sps:$4 sm:$0xff]  }
 0x1d2   :  { %2239 = vmatpush1.bf16.msra.mxu0 %v4094_v62  ;;  %v4204_v62 = vld [vmem:[#allocation8 + $0x184] ss:$8 sps:$4 sm:$0xff]  }
 0x1d3   :  { %2240 = vmatprep.subr.bf16.mxu0 %v4099_v63  ;;  %v4202_v63 = vld [vmem:[#allocation8 + $0x180] ss:$8 sps:$4 sm:$0xff]  }
 0x1d6   :  { %2241 = vmatpush1.bf16.msra.mxu0 %v4097_v9  ;;  %v4207_v9 = vld [vmem:[#allocation8 + $0x194] ss:$8 sps:$4 sm:$0xff]  }
 0x1d7   :  { %2242 = vmatprep.subr.bf16.mxu0 %v4102_v0  ;;  %v4205_v0 = vld [vmem:[#allocation8 + $0x190] ss:$8 sps:$4 sm:$0xff]  }
 0x1da   :  { %2243 = vmatpush1.bf16.msra.mxu0 %v4100_v15  ;;  %v4210_v15 = vld [vmem:[#allocation8 + $0x1a4] ss:$8 sps:$4 sm:$0xff]  }
 0x1db   :  { %2244 = vmatprep.subr.bf16.mxu0 %v4105_v1  ;;  %v421_v1 = vsub.s32 2, %v4698_v23 }
 0x1de   :  { %2245 = vmatpush1.bf16.msra.mxu0 %v4103_v2  ;;  %v4208_v2 = vld [vmem:[#allocation8 + $0x1a0] ss:$8 sps:$4 sm:$0xff]  }
 0x1df   :  { %2246 = vmatprep.subr.bf16.mxu0 %v4108_v3  ;;  %v4213_v3 = vld [vmem:[#allocation8 + $0x1b4] ss:$8 sps:$4 sm:$0xff]  }
 0x1e2   :  { %2247 = vmatpush1.bf16.msra.mxu0 %v4106_v4  ;;  %v422_v4 = vrot.slane %v4701_v24, %v421_v1  ;;  %v429_v1 = vsub.s32 4, %v4698_v23 }
 0x1e3   :  { %2248 = vmatprep.subr.bf16.mxu0 %v4111_v6  ;;  %v4211_v6 = vld [vmem:[#allocation8 + $0x1b0] ss:$8 sps:$4 sm:$0xff]  }
 0x1e6   :  { %2249 = vmatpush1.bf16.msra.mxu0 %v4109_v7  ;;  %v4216_v7 = vld [vmem:[#allocation8 + $0x1c4] ss:$8 sps:$4 sm:$0xff]  }
 0x1e7   :  { %2250 = vmatprep.subr.bf16.mxu0 %v4117_v8 }
 0x1ea   :  { %2251 = vmatpush1.bf16.msra.mxu0 %v4115_v10  ;;  %v4214_v10 = vld [vmem:[#allocation8 + $0x1c0] ss:$8 sps:$4 sm:$0xff]  }
 0x1eb   :  { %2252 = vmatprep.subr.bf16.mxu0 %v4123_v11  ;;  %v4219_v11 = vld [vmem:[#allocation8 + $0x1d4] ss:$8 sps:$4 sm:$0xff]  }
 0x1ee   :  { %2253 = vmatpush1.bf16.msra.mxu0 %v4121_v12  ;;  %v4217_v12 = vld [vmem:[#allocation8 + $0x1d0] ss:$8 sps:$4 sm:$0xff]  }
 0x1ef   :  { %2254 = vmatprep.subr.bf16.mxu0 %v4129_v14  ;;  %v4222_v14 = vld [vmem:[#allocation8 + $0x1e4] ss:$8 sps:$4 sm:$0xff]  }
 0x1f2   :  { %2255 = vmatpush1.bf16.msra.mxu0 %v4127_v5  ;;  %v4220_v5 = vld [vmem:[#allocation8 + $0x1e0] ss:$8 sps:$4 sm:$0xff]  }
 0x1f3   :  { %2256 = vmatprep.subr.bf16.mxu0 %v4135_v16  ;;  %v4225_v16 = vld [vmem:[#allocation8 + $0x1f4] ss:$8 sps:$4 sm:$0xff]  }
 0x1f6   :  { %2257 = vmatpush1.bf16.msra.mxu0 %v4133_v18  ;;  %v4223_v18 = vld [vmem:[#allocation8 + $0x1f0] ss:$8 sps:$4 sm:$0xff]  }
 0x1f7   :  { %2258 = vmatprep.subr.bf16.mxu0 %v4141_v30  ;;  %v4228_v30 = vld [vmem:[#allocation8 + $0x204] ss:$8 sps:$4 sm:$0xff]  }
 0x1fa   :  { %2259 = vmatpush1.bf16.msra.mxu0 %v4139_v19 }
 0x1fb   :  { %2260 = vmatprep.subr.bf16.mxu0 %v4147_v20  ;;  %v4226_v20 = vld [vmem:[#allocation8 + $0x200] ss:$8 sps:$4 sm:$0xff]  }
 0x1fe   :  { %2261 = vmatpush1.bf16.msra.mxu0 %v4145_v21 }
 0x201   :  { %2263 = vmatmul.mubr.bf16.vlgmr.msra.gmra.mrb[4].mxu0 %v4688_v17  ;;  %v426_v17 = vrot.slane %v4701_v24, %v425_v26  ;;  %v4274_v26 = vld [vmem:[#allocation11 + $0x40] sm:$0xff]  }
 0x202   :  { %3615 = vmatprep.subr.bf16.mxu0 %v4274_v26 }
 0x214   :  { %v2018_v29 = vpop.f32.mrb[0].mxu0 }
 0x215   :  { %v4712_v48 = vpop.f32.mrb[0].mxu1  ;;  %v3637_v31 = vadd.f32 %v2018_v29, %v414_v27  ;;  %v2020_v32 = vpop.f32.mrb[1].mxu0  ;;  %v4275_v27 = vld [vmem:[#allocation11] sm:$0xff]  }
 0x216   :  { %v2143_v33 = vpop.f32.mrb[1].mxu1  ;;  %v3638_v34 = vadd.f32 %v2020_v32, %v418_v28  ;;  %v2022_v36 = vpop.f32.mrb[2].mxu0  ;;  %v3639_v8 = vadd.f32 %v4712_v48, %v422_v4  ;;  %v4276_v28 = vld [vmem:[#allocation11 + $0x48] sm:$0xff]   ;;  %3616 = vmatpush3.bf16.msra.mxu0 %v4275_v27 }
 0x217   :  { %v3640_v35 = vadd.f32 %v2143_v33, %v426_v17  ;;  %v2145_v37 = vpop.f32.mrb[2].mxu1  ;;  %v2023_v38 = vpop.f32.mrb[3].mxu0  ;;  %4290 = vtanh.f32 %v3637_v31  ;;  %v4229_v17 = vld [vmem:[#allocation8 + $0x210] ss:$8 sps:$4 sm:$0xff]   ;;  %v4234_v29 = vld [vmem:[#allocation8 + $0x224] ss:$8 sps:$4 sm:$0xff]   ;;  %3617 = vmatprep.subr.bf16.mxu0 %v4276_v28 }
 0x218   :  { %v2146_v39 = vpop.f32.mrb[3].mxu1  ;;  %4292 = vtanh.f32 %v3638_v34  ;;  %v4277_v48 = vld [vmem:[#allocation11 + $0x8] sm:$0xff]   ;;  %v4278_v31 = vld [vmem:[#allocation11 + $0x50] sm:$0xff]   ;;  %v4281_v38 = vld [vmem:[#allocation11 + $0x18] sm:$0xff]  }
 0x219   :  { %4294 = vtanh.f32 %v3640_v35  ;;  %v4232_v32 = vld [vmem:[#allocation8 + $0x220] ss:$8 sps:$4 sm:$0xff]   ;;  %v4237_v33 = vld [vmem:[#allocation8 + $0x234] ss:$8 sps:$4 sm:$0xff]   ;;  %v4235_v36 = vld [vmem:[#allocation8 + $0x230] ss:$8 sps:$4 sm:$0xff]  }
 0x21a   :  { %4296 = vtanh.f32 %v3639_v8  ;;  %3618 = vmatpush3.bf16.msra.mxu0 %v4277_v48  ;;  %v4279_v34 = vld [vmem:[#allocation11 + $0x10] sm:$0xff]   ;;  %v4280_v35 = vld [vmem:[#allocation11 + $0x58] sm:$0xff]   ;;  %v4240_v37 = vld [vmem:[#allocation8 + $0x244] ss:$8 sps:$4 sm:$0xff]  }
 0x21b   :  { %3619 = vmatprep.subr.bf16.mxu0 %v4278_v31  ;;  %v4282_v39 = vld [vmem:[#allocation11 + $0x60] sm:$0xff]  }
 0x21e   :  { %3620 = vmatpush3.bf16.msra.mxu0 %v4279_v34 }
 0x21f   :  { %3621 = vmatprep.subr.bf16.mxu0 %v4280_v35 }
 0x221   :  { %v4291_v40 = vpop.eup %4290 }
 0x222   :  { %v4293_v41 = vpop.eup %4292  ;;  %v2277_v45 = vpack.c.bf16 %v4291_v40, %v4291_v40  ;;  %v4238_v40 = vld [vmem:[#allocation8 + $0x240] ss:$8 sps:$4 sm:$0xff]   ;;  %3622 = vmatpush3.bf16.msra.mxu0 %v4281_v38 }
 0x223   :  { %v4295_v42 = vpop.eup %4294  ;;  %v2278_v43 = vpack.c.bf16 %v4293_v41, %v4293_v41  ;;  %v4243_v41 = vld [vmem:[#allocation8 + $0x254] ss:$8 sps:$4 sm:$0xff]   ;;  %3623 = vmatprep.subr.bf16.mxu0 %v4282_v39 }
 0x224   :  { %v2280_v46 = vpack.c.bf16 %v4295_v42, %v4295_v42  ;;  %v4297_v19 = vpop.eup %4296  ;;  %v4283_v42 = vld [vmem:[#allocation11 + $0x20] sm:$0xff]  }
 0x225   :  { %2903 = vmatprep.mubr.bf16.mxu1 %v2278_v43  ;;  %v2279_v21 = vpack.c.bf16 %v4297_v19, %v4297_v19  ;;  %v4284_v43 = vld [vmem:[#allocation11 + $0x68] sm:$0xff]   ;;  %v4287_v19 = vld [vmem:[#allocation11 + $0x30] sm:$0xff]  }
 0x226   :  { %2904 = vmatmul.mubr.bf16.vlgmr.msra.gmra.mrb[4].mxu1 %v2277_v45  ;;  %v4246_v45 = vld [vmem:[#allocation8 + $0x264] ss:$8 sps:$4 sm:$0xff]   ;;  %3624 = vmatpush3.bf16.msra.mxu0 %v4283_v42 }
 0x227   :  { %2913 = vmatpush1.bf16.msra.mxu1 %v4178_v44  ;;  %2944 = vmatprep.mubr.bf16.mxu1 %v2280_v46  ;;  %v4241_v44 = vld [vmem:[#allocation8 + $0x250] ss:$8 sps:$4 sm:$0xff]  }
 0x228   :  { %2914 = vmatprep.subr.bf16.mxu1 %v4183_v47  ;;  %v4285_v46 = vld [vmem:[#allocation11 + $0x28] sm:$0xff]   ;;  %3625 = vmatprep.subr.bf16.mxu0 %v4284_v43 }
 0x229   :  { %v4244_v47 = vld [vmem:[#allocation8 + $0x260] ss:$8 sps:$4 sm:$0xff]  }
 0x22a   :  { %3626 = vmatpush3.bf16.msra.mxu0 %v4285_v46 }
 0x22b   :  { %2915 = vmatpush1.bf16.msra.mxu1 %v4181_v49  ;;  %v4249_v49 = vld [vmem:[#allocation8 + $0x274] ss:$8 sps:$4 sm:$0xff]  }
 0x22c   :  { %2916 = vmatprep.subr.bf16.mxu1 %v4186_v50  ;;  %v4247_v50 = vld [vmem:[#allocation8 + $0x270] ss:$8 sps:$4 sm:$0xff]  }
 0x22f   :  { %2917 = vmatpush1.bf16.msra.mxu1 %v4184_v51  ;;  %v4252_v51 = vld [vmem:[#allocation8 + $0x284] ss:$8 sps:$4 sm:$0xff]  }
 0x230   :  { %2918 = vmatprep.subr.bf16.mxu1 %v4189_v52  ;;  %v4250_v52 = vld [vmem:[#allocation8 + $0x280] ss:$8 sps:$4 sm:$0xff]  }
 0x233   :  { %2919 = vmatpush1.bf16.msra.mxu1 %v4187_v53  ;;  %v4255_v53 = vld [vmem:[#allocation8 + $0x294] ss:$8 sps:$4 sm:$0xff]  }
 0x234   :  { %2920 = vmatprep.subr.bf16.mxu1 %v4192_v54  ;;  %v4253_v54 = vld [vmem:[#allocation8 + $0x290] ss:$8 sps:$4 sm:$0xff]  }
 0x237   :  { %2921 = vmatpush1.bf16.msra.mxu1 %v4190_v55  ;;  %v4258_v55 = vld [vmem:[#allocation8 + $0x2a4] ss:$8 sps:$4 sm:$0xff]  }
 0x238   :  { %2922 = vmatprep.subr.bf16.mxu1 %v4195_v56  ;;  %v4256_v56 = vld [vmem:[#allocation8 + $0x2a0] ss:$8 sps:$4 sm:$0xff]  }
 0x23b   :  { %2923 = vmatpush1.bf16.msra.mxu1 %v4193_v57  ;;  %v4261_v57 = vld [vmem:[#allocation8 + $0x2b4] ss:$8 sps:$4 sm:$0xff]  }
 0x23c   :  { %2924 = vmatprep.subr.bf16.mxu1 %v4198_v58  ;;  %v4259_v58 = vld [vmem:[#allocation8 + $0x2b0] ss:$8 sps:$4 sm:$0xff]  }
 0x23f   :  { %2925 = vmatpush1.bf16.msra.mxu1 %v4196_v59  ;;  %v4264_v59 = vld [vmem:[#allocation8 + $0x2c4] ss:$8 sps:$4 sm:$0xff]  }
 0x240   :  { %2926 = vmatprep.subr.bf16.mxu1 %v4201_v60  ;;  %v4262_v60 = vld [vmem:[#allocation8 + $0x2c0] ss:$8 sps:$4 sm:$0xff]  }
 0x243   :  { %2927 = vmatpush1.bf16.msra.mxu1 %v4199_v61  ;;  %v4267_v61 = vld [vmem:[#allocation8 + $0x2d4] ss:$8 sps:$4 sm:$0xff]  }
 0x244   :  { %2928 = vmatprep.subr.bf16.mxu1 %v4204_v62  ;;  %v4265_v62 = vld [vmem:[#allocation8 + $0x2d0] ss:$8 sps:$4 sm:$0xff]  }
 0x247   :  { %2929 = vmatpush1.bf16.msra.mxu1 %v4202_v63  ;;  %v4270_v63 = vld [vmem:[#allocation8 + $0x2e4] ss:$8 sps:$4 sm:$0xff]  }
 0x248   :  { %2930 = vmatprep.subr.bf16.mxu1 %v4207_v9  ;;  %v4268_v9 = vld [vmem:[#allocation8 + $0x2e0] ss:$8 sps:$4 sm:$0xff]  }
 0x24b   :  { %2931 = vmatpush1.bf16.msra.mxu1 %v4205_v0  ;;  %v4273_v0 = vld [vmem:[#allocation8 + $0x2f4] ss:$8 sps:$4 sm:$0xff]  }
 0x24c   :  { %2932 = vmatprep.subr.bf16.mxu1 %v4210_v15  ;;  %v4271_v15 = vld [vmem:[#allocation8 + $0x2f0] ss:$8 sps:$4 sm:$0xff]  }
 0x24f   :  { %2933 = vmatpush1.bf16.msra.mxu1 %v4208_v2  ;;  %v433_v2 = vsub.s32 5, %v4698_v23 }
 0x250   :  { %2934 = vmatprep.subr.bf16.mxu1 %v4213_v3  ;;  %v430_v3 = vrot.slane %v4701_v24, %v429_v1 }
 0x251   :  { %v434_v4 = vrot.slane %v4701_v24, %v433_v2  ;;  %v4289_v24 = vld [vmem:[#allocation11 + $0x38] sm:$0xff]  }
 0x253   :  { %2935 = vmatpush1.bf16.msra.mxu1 %v4211_v6 }
 0x254   :  { %2936 = vmatprep.subr.bf16.mxu1 %v4216_v7 }
 0x257   :  { %2937 = vmatpush1.bf16.msra.mxu1 %v4214_v10 }
 0x258   :  { %2938 = vmatprep.subr.bf16.mxu1 %v4219_v11 }
 0x25b   :  { %2939 = vmatpush1.bf16.msra.mxu1 %v4217_v12 }
 0x25c   :  { %2940 = vmatprep.subr.bf16.mxu1 %v4222_v14 }
 0x25f   :  { %2941 = vmatpush1.bf16.msra.mxu1 %v4220_v5 }
 0x260   :  { %2942 = vmatprep.subr.bf16.mxu1 %v4225_v16 }
 0x263   :  { %2943 = vmatpush1.bf16.msra.mxu1 %v4223_v18 }
 0x264   :  { %2953 = vmatprep.subr.bf16.mxu1 %v4228_v30  ;;  %v4286_v30 = vld [vmem:[#allocation11 + $0x70] sm:$0xff]  }
 0x265   :  { %3627 = vmatprep.subr.bf16.mxu0 %v4286_v30 }
 0x266   :  { %2945 = vmatmul.mubr.bf16.vlgmr.msra.gmra.mrb[4].mxu1 %v2279_v21  ;;  %3628 = vmatpush3.bf16.msra.mxu0 %v4287_v19  ;;  %v2379_v21 = vld [vmem:[#allocation10] sm:$0x3] }
 0x267   :  { %2954 = vmatpush1.bf16.msra.mxu1 %v4226_v20  ;;  %v4288_v20 = vld [vmem:[#allocation11 + $0x78] sm:$0xff]   ;;  %v2388_v26 = vrot.slane %v2379_v21, %v417_v25 }
 0x268   :  { %2955 = vmatprep.subr.bf16.mxu1 %v4231_v22  ;;  %3629 = vmatprep.subr.bf16.mxu0 %v4288_v20  ;;  %v2384_v22 = vrot.slane %v2379_v21, %v413_v13 }
 0x26a   :  { %3630 = vmatpush3.bf16.msra.mxu0 %v4289_v24 }
 0x26b   :  { %2956 = vmatpush1.bf16.msra.mxu1 %v4229_v17 }
 0x26c   :  { %2957 = vmatprep.subr.bf16.mxu1 %v4234_v29 }
 0x26f   :  { %2958 = vmatpush1.bf16.msra.mxu1 %v4232_v32 }
 0x270   :  { %2959 = vmatprep.subr.bf16.mxu1 %v4237_v33 }
 0x273   :  { %2960 = vmatpush1.bf16.msra.mxu1 %v4235_v36 }
 0x274   :  { %2961 = vmatprep.subr.bf16.mxu1 %v4240_v37 }
 0x277   :  { %2962 = vmatpush1.bf16.msra.mxu1 %v4238_v40 }
 0x278   :  { %2963 = vmatprep.subr.bf16.mxu1 %v4243_v41 }
 0x27b   :  { %2964 = vmatpush1.bf16.msra.mxu1 %v4241_v44 }
 0x27c   :  { %2965 = vmatprep.subr.bf16.mxu1 %v4246_v45 }
 0x27f   :  { %2966 = vmatpush1.bf16.msra.mxu1 %v4244_v47 }
 0x280   :  { %2967 = vmatprep.subr.bf16.mxu1 %v4249_v49 }
 0x283   :  { %2968 = vmatpush1.bf16.msra.mxu1 %v4247_v50 }
 0x284   :  { %2969 = vmatprep.subr.bf16.mxu1 %v4252_v51 }
 0x287   :  { %2970 = vmatpush1.bf16.msra.mxu1 %v4250_v52 }
 0x288   :  { %2971 = vmatprep.subr.bf16.mxu1 %v4255_v53 }
 0x28b   :  { %2972 = vmatpush1.bf16.msra.mxu1 %v4253_v54 }
 0x28c   :  { %2973 = vmatprep.subr.bf16.mxu1 %v4258_v55 }
 0x28f   :  { %2974 = vmatpush1.bf16.msra.mxu1 %v4256_v56 }
 0x290   :  { %2975 = vmatprep.subr.bf16.mxu1 %v4261_v57 }
 0x293   :  { %2976 = vmatpush1.bf16.msra.mxu1 %v4259_v58 }
 0x294   :  { %2977 = vmatprep.subr.bf16.mxu1 %v4264_v59 }
 0x297   :  { %2978 = vmatpush1.bf16.msra.mxu1 %v4262_v60 }
 0x298   :  { %2979 = vmatprep.subr.bf16.mxu1 %v4267_v61 }
 0x29b   :  { %2980 = vmatpush1.bf16.msra.mxu1 %v4265_v62 }
 0x29c   :  { %2981 = vmatprep.subr.bf16.mxu1 %v4270_v63 }
 0x29f   :  { %2982 = vmatpush1.bf16.msra.mxu1 %v4268_v9 }
 0x2a0   :  { %2983 = vmatprep.subr.bf16.mxu1 %v4273_v0 }
 0x2a3   :  { %2984 = vmatpush1.bf16.msra.mxu1 %v4271_v15 }
 0x2d4   :  { %v2264_v6 = vpop.f32.mrb[4].mxu0 }
 0x2d5   :  { %v3641_v7 = vadd.f32 %v2264_v6, %v430_v3  ;;  %v2266_v8 = vpop.f32.mrb[5].mxu0 }
 0x2d6   :  { %v3642_v10 = vadd.f32 %v2266_v8, %v434_v4  ;;  %v2268_v11 = vpop.f32.mrb[6].mxu0 }
 0x2d7   :  { %4298 = vtanh.f32 %v3641_v7  ;;  %v2269_v12 = vpop.f32.mrb[7].mxu0 }
 0x2d8   :  { %4300 = vtanh.f32 %v3642_v10 }
 0x2e1   :  { %v4299_v14 = vpop.eup %4298 }
 0x2e2   :  { %v4301_v5 = vpop.eup %4300  ;;  %v2281_v18 = vpack.c.bf16 %v4299_v14, %v4299_v14 }
 0x2e3   :  { %v2282_v16 = vpack.c.bf16 %v4301_v5, %v4301_v5 }
 0x2e5   :  { %2985 = vmatprep.mubr.bf16.mxu1 %v2282_v16 }
 0x2e6   :  { %2986 = vmatmul.mubr.bf16.vlgmr.msra.gmra.mrb[4].mxu1 %v2281_v18 }
 0x3b9   :  { %v2987_v27 = vpop.f32.mrb[4].mxu1 }
 0x3ba   :  { %v3643_v28 = vadd.f32 %v2987_v27, %v2384_v22  ;;  %v2989_v17 = vpop.f32.mrb[5].mxu1 }
 0x3bb   :  { %v3644_v29 = vadd.f32 %v2989_v17, %v2388_v26  ;;  %v2991_v48 = vpop.f32.mrb[6].mxu1 }
 0x3bc   :  { %2994 = vst [vmem:[#allocation15] sm:$0xff] %v3643_v28  ;;  %v2996_v31 = vmax.f32 %v3643_v28, 0.0  ;;  %v2992_v32 = vpop.f32.mrb[7].mxu1 }
 0x3bd   :  { %2995 = vst [vmem:[#allocation15 + $0x8] sm:$0xff] %v3644_v29  ;;  %v2997_v33 = vmax.f32 %v3644_v29, 0.0 }
 0x3be   :  { %v2998_v35 = vpack.c.bf16 %v2996_v31, %v2996_v31 }
 0x3bf   :  { %v2999_v34 = vpack.c.bf16 %v2997_v33, %v2997_v33 }
 0x3c1   :  { %3167 = vmatprep.mubr.bf16.mxu0 %v2999_v34 }
 0x3c2   :  { %3168 = vmatmul.mubr.bf16.vlgmr.msra.gmra.mrb[8].mxu0 %v2998_v35 }
 0x3c3   :  { %4467 = shalt.err (!%p4464_p4)
}
 0x3c4   :  { %s4468_s22 = scalar_lea.hbm %s4757_s8, 256 }
 0x3c5   :  { %p4469_p5 = scmp.ne.s32.totalorder %s4757_s8, %s4468_s22  ;;  %p4472_p6 = scmp.lt.u32.totalorder %s4468_s22, %s4757_s8 }
 0x3c7   :  { %p4474_p7 = pnand %p4472_p6, %p4469_p5 }
 0x3c9   :  { %4477 = shalt.err (!%p4474_p7)
}
 0x3ca   :  { %3195 = dma.vmem_to_hbm [thread:$0]  %s3193_s3, 256, %s4757_s8, [#allocation16]   ;;  %v3598_v13 = vld [vmem:[#allocation13] ss:$0 sm:$0xff] }
 0x3cb   :  { %s4526_s28 = smov [#allocation14]  }
 0x3cc   :  { %s3182_s30 = sshll.u32 %s4526_s28, 4  ;;  %s3183_s30 = int_to_ptr.vmem [resolvable:$true] %s3182_s30 }
 0x3cd   :  { %s4478_s9 = scalar_lea.vmem %s3183_s30, 128  ;;  %p4483_p9 = scmp.lt.s32.totalorder %s3183_s30, %s3183_s30 }
 0x3ce   :  { %p4479_p8 = scmp.ne.s32.totalorder %s3183_s30, %s4478_s9  ;;  %p4484_p10 = scmp.lt.s32.totalorder %s4478_s9, %s4478_s9 }
 0x3d0   :  { %p4485_p11 = por %p4484_p10, %p4483_p9 }
 0x3d2   :  { %p4486_p12 = pnand %p4485_p11, %p4479_p8 }
 0x495   :  { %v3631_v23 = vpop.f32.mrb[8].mxu0 }
 0x496   :  { %v3632_v25 = vpop.f32.mrb[9].mxu0 }
 0x497   :  { %v3633_v36 = vadd.f32 %v3632_v25, %v3631_v23  ;;  %v3634_v37 = vpop.f32.mrb[10].mxu0 }
 0x498   :  { %v3635_v38 = vpop.f32.mrb[11].mxu0 }
 0x499   :  { %v3170_v39 = vadd.f32 %v3633_v36, %v3598_v13 }
 0x49b   :  { %3175 = vst [vmem:[#allocation14] sm:$0xff] %v3170_v39 }
 0x49c   :  { %4489 = shalt.err (!%p4486_p12)
}
 0x49d   :  { %s4490_s26 = scalar_lea.hbm %s4756_s7, 128 }
 0x49e   :  { %p4491_p13 = scmp.ne.s32.totalorder %s4756_s7, %s4490_s26  ;;  %p4494_p0 = scmp.lt.u32.totalorder %s4490_s26, %s4756_s7 }
 0x4a0   :  { %p4496_p1 = pnand %p4494_p0, %p4491_p13 }
 0x4a2   :  { %4499 = shalt.err (!%p4496_p1)
}
 0x4a3   :  { %3185 = dma.vmem_to_hbm [thread:$0]  %s3183_s30, 128, %s4756_s7, [#allocation4]  }
 0x4a4   :  { %4508 = dma.done.wait [#allocation4], 128  }
 0x4a5   :  { %4509 = vsyncadd [#allocation4], 4294967168 }
 0x4a6   :  { %4510 = dma.done.wait [#allocation16], 256  }
 0x4a7   :  { %4511 = vsyncadd [#allocation16], 4294967040 }
 0x4a8   :  { %3202 = vsyncpa [#allocation3], 1 }
 0x4a9   :  { %3203 = vsyncpa [#allocation6], 1 }
 0x4aa   :  { %3204 = vsyncpa [#allocation9], 1 }
 0x4ab   :  { %3205 = vsyncpa [#allocation12], 1 }
 0x4ac   :  { %3206 = vsyncpa [#allocation4], 1 }
 0x4ad   :  { %3207 = vsyncpa [#allocation16], 1 }

</bundles_post_ra>
